<compile_context>
chip_gen: v7x
topology: tpu7x:2x2x1
jax: 0.10.0
libtpu: 0.0.40
codegen_flags: <defaults>
</compile_context>

<pallas_src>
import functools
import math

import jax
import jax.numpy as jnp
from jax.experimental import pallas as pl
from jax.experimental.pallas import tpu as pltpu


def _round_up(x, m):
    return (x + m - 1) // m * m


# ----------------------------------------------------------------------------
# Pallas kernel: fused conv3x3 (+folded BN) + global average pool + sigmoid
# ----------------------------------------------------------------------------
def _sobel_conv_pool_kernel(x_ref, m_ref, w_ref, b_ref, o_ref, lhs_ref,
                            *, tq, wp, cin, k, inv_hw):
    """
    x_ref  : (1, 1, TIN, Cin)   f32  flattened spatial window (+halo) for one
                                     (batch, tile) grid point
    m_ref  : (1, TQ, 1)         f32  validity mask (drops wrap columns)
    w_ref  : (K*K*Cin, Coutp)   bf16 fused conv weight (BN scale folded,
                                     Cout zero-padded to a lane multiple)
    b_ref  : (1, Coutp)         f32  fused bias/shift (applied after pooling)
    o_ref  : (1, 8, Coutp)      f32  per-batch result (resident accumulator)
    lhs_ref: (TQ, K*K*Cin)      bf16 VMEM scratch holding the packed taps
    """
    t = pl.program_id(1)

    @pl.when(t == 0)
    def _init():
        o_ref[...] = jnp.zeros_like(o_ref)

    # In-VMEM im2col: pack the K*K shifted taps side by side along the lane
    # axis so a single MXU matmul contracts over the full K*K*Cin depth.
    for r in range(k):
        for c in range(k):
            i = r * k + c
            off = r * wp + c                                    # static offset
            tap = x_ref[0, 0, off:off + tq, :]                  # (TQ, Cin) f32
            lhs_ref[:, i * cin:(i + 1) * cin] = tap.astype(jnp.bfloat16)

    # One bf16 MXU matmul, f32 accumulation, lane-dense (128-padded) Cout.
    y = jnp.dot(lhs_ref[...], w_ref[...],
                preferred_element_type=jnp.float32)             # (TQ, Coutp)

    # Mask the per-row wrap columns of the flattened layout, then reduce this
    # tile's contribution to the global average pool.
    part = jnp.sum(y * m_ref[0], axis=0, keepdims=True)         # (1, Coutp)
    o_ref[0] += part

    @pl.when(t == pl.num_programs(1) - 1)
    def _finalize():
        o_ref[0] = jax.nn.sigmoid(o_ref[0] * inv_hw + b_ref[...])


# ----------------------------------------------------------------------------
# Wrapper
# ----------------------------------------------------------------------------
def sobel_conv_forward(x_nchw, params, *, tq_max=512):
    """Sobel_conv.forward: sigmoid(AvgPool(BN(Conv2d(C, C, 3, 1, 1)(x)))).

    x_nchw: (N, C, H, W) float32 (PyTorch NCHW convention).
    Returns (N, C, 1, 1) float32.
    """
    n, cin, h, w = x_nchw.shape
    w_hwio = params["w"]                       # (3, 3, Cin, Cout) HWIO weight
    k = w_hwio.shape[0]
    cout = w_hwio.shape[-1]
    eps = 1e-5

    # TODO(synk): BatchNorm2d is folded in eval mode (running statistics);
    # train-mode batch statistics are not implemented.
    s_bn = params["gamma"] / jnp.sqrt(params["var"] + eps)
    shift = params["beta"] - params["mean"] * s_bn

    # Fold the BN scale into the weights; pad Cout to a lane multiple (128).
    coutp = _round_up(cout, 128)
    wf = (w_hwio * s_bn[None, None, None, :]).reshape(k * k * cin, cout)
    wf = jnp.pad(wf, ((0, 0), (0, coutp - cout))).astype(jnp.bfloat16)
    bf = jnp.pad(params["bias"] * s_bn + shift, (0, coutp - cout))
    bf = bf.reshape(1, coutp).astype(jnp.float32)

    # NCHW -> NHWC, zero-pad one pixel, flatten the spatial axes so the K*K
    # taps become static row offsets along a single flattened axis.
    x_nhwc = jnp.transpose(x_nchw, (0, 2, 3, 1)).astype(jnp.float32)
    xp = jnp.pad(x_nhwc, ((0, 0), (1, 1), (1, 1), (0, 0)))      # (N, H+2, W+2, C)
    wp = w + 2
    l_flat = (h + 2) * wp
    qtot = h * wp                      # flattened output positions (incl. wrap cols)
    tq = min(tq_max, _round_up(qtot, 8))
    n_tiles = pl.cdiv(qtot, tq)
    tin = tq + (k - 1) * wp + (k - 1)  # per-tile window length (tile + halo)
    l_need = (n_tiles - 1) * tq + tin
    xflat = xp.reshape(n, l_flat, cin)
    xflat = jnp.pad(xflat, ((0, 0), (0, l_need - l_flat), (0, 0)))
    # Overlapping per-tile windows: only the 2-row halo per tile is duplicated
    # (~1x HBM input traffic instead of the 9x of a materialized im2col).
    windows = jnp.stack(
        [xflat[:, t * tq:t * tq + tin, :] for t in range(n_tiles)], axis=1)

    # Static validity mask: the two wrap columns of every flattened image row
    # (and nothing else) must not contribute to the average pool.
    q = jnp.arange(n_tiles * tq, dtype=jnp.int32)
    mask = ((q % wp) < w).astype(jnp.float32).reshape(n_tiles, tq, 1)

    kern = functools.partial(_sobel_conv_pool_kernel, tq=tq, wp=wp, cin=cin,
                             k=k, inv_hw=1.0 / float(h * w))
    out = pl.pallas_call(
        kern,
        out_shape=jax.ShapeDtypeStruct((n, 8, coutp), jnp.float32),
        grid=(n, n_tiles),
        in_specs=[
            pl.BlockSpec((1, 1, tin, cin), lambda i, t: (i, t, 0, 0)),
            pl.BlockSpec((1, tq, 1), lambda i, t: (t, 0, 0)),
            pl.BlockSpec((k * k * cin, coutp), lambda i, t: (0, 0)),
            pl.BlockSpec((1, coutp), lambda i, t: (0, 0)),
        ],
        out_specs=pl.BlockSpec((1, 8, coutp), lambda i, t: (i, 0, 0)),
        scratch_shapes=[pltpu.VMEM((tq, k * k * cin), jnp.bfloat16)],
        compiler_params=pltpu.CompilerParams(
            dimension_semantics=("parallel", "arbitrary"),
            vmem_limit_bytes=32 * 1024 * 1024),
    )(windows, mask, wf, bf)

    return out[:, 0, :cout].reshape(n, cout, 1, 1)


# ----------------------------------------------------------------------------
# Deterministic parameters + plain-JAX reference (for the self-check)
# ----------------------------------------------------------------------------
def init_sobel_conv_params(key, in_channels):
    """Conv2d(C, C, 3, 1, 1) + BatchNorm2d(C) parameters (eval-mode BN)."""
    c = in_channels
    kw, kb = jax.random.split(key)
    w_hwio = jax.random.normal(kw, (3, 3, c, c), jnp.float32) * math.sqrt(2.0 / (9 * c))
    bias = jax.random.normal(kb, (c,), jnp.float32) * 0.05
    return dict(w=w_hwio, bias=bias,
                gamma=jnp.ones((c,), jnp.float32),
                beta=jnp.zeros((c,), jnp.float32),
                mean=jnp.zeros((c,), jnp.float32),
                var=jnp.ones((c,), jnp.float32))


def sobel_conv_reference(x_nchw, params):
    """Plain-JAX (f32) reference of Sobel_conv.forward."""
    x = jnp.transpose(x_nchw, (0, 2, 3, 1))
    y = jax.lax.conv_general_dilated(
        x, params["w"], window_strides=(1, 1), padding="SAME",
        dimension_numbers=("NHWC", "HWIO", "NHWC"),
        precision=jax.lax.Precision.HIGHEST) + params["bias"]
    s = params["gamma"] / jnp.sqrt(params["var"] + 1e-5)
    y = (y - params["mean"]) * s + params["beta"]
    pooled = jnp.mean(y, axis=(1, 2))                 # AdaptiveAvgPool2d(1)
    return jax.nn.sigmoid(pooled).reshape(x.shape[0], -1, 1, 1)


# ----------------------------------------------------------------------------
if __name__ == "__main__":
    key = jax.random.PRNGKey(0)
    k_x, k_p = jax.random.split(key)

    # Sobel_conv(in_channels=32, out_channels=32); out_channels is unused by
    # forward (self.out is dead code).
    N, C, H, W = 2, 32, 16, 16
    x = jax.random.uniform(k_x, (N, C, H, W), jnp.float32, -1.0, 1.0)
    params = init_sobel_conv_params(k_p, C)

    # tq_max=128 so even this small demo exercises the multi-tile
    # accumulating code path; realistic resolutions use the default (512).
    out = sobel_conv_forward(x, params, tq_max=128)
    out = jax.block_until_ready(out)
    assert out.shape == (N, C, 1, 1)

    ref = jax.block_until_ready(sobel_conv_reference(x, params))
    max_err = float(jnp.max(jnp.abs(out - ref)))
    assert max_err < 3e-2, f"mismatch vs reference: max abs err {max_err}"
    print("KERNEL_OK")
</pallas_src>

<mosaic_0001>
module attributes {stable_mosaic.version = 11 : i64} {
  func.func @_sobel_conv_pool_kernel(%arg0: i32, %arg1: i32, %arg2: memref<1x1x166x32xf32, #tpu.memory_space<vmem>>, %arg3: memref<1x128x1xf32, #tpu.memory_space<vmem>>, %arg4: memref<288x128xbf16, #tpu.memory_space<vmem>>, %arg5: memref<1x128xf32, #tpu.memory_space<vmem>>, %arg6: memref<1x8x128xf32, #tpu.memory_space<vmem>>, %arg7: memref<128x288xbf16, #tpu.memory_space<vmem>>) attributes {dimension_semantics = [#tpu.dimension_semantics<parallel>, #tpu.dimension_semantics<arbitrary>], iteration_bounds = array<i64: 2, 3>, scalar_prefetch = 0 : i64, scratch_operands = 1 : i64, tpu.core_type = #tpu.core_type<tc>, window_params = [{transform_indices = @transform_0, window_bounds = array<i64: 1, 1, 166, 32>}, {transform_indices = @transform_1, window_bounds = array<i64: 1, 128, 1>}, {pipeline_mode = #tpu.pipeline_mode<synchronous>, transform_indices = @transform_2, window_bounds = array<i64: 288, 128>}, {pipeline_mode = #tpu.pipeline_mode<synchronous>, transform_indices = @transform_3, window_bounds = array<i64: 1, 128>}, {transform_indices = @transform_4, window_bounds = array<i64: 1, 8, 128>}]} {
    %c0_i32 = arith.constant 0 : i32
    %0 = arith.cmpi eq, %arg1, %c0_i32 : i32
    %1 = arith.extui %0 : i1 to i32
    %c0_i32_0 = arith.constant 0 : i32
    %2 = arith.cmpi ne, %1, %c0_i32_0 : i32
    scf.if %2 {
      %cst_53 = arith.constant 0.000000e+00 : f32
      %58 = vector.broadcast %cst_53 : f32 to vector<1x8x128xf32>
      %c0_54 = arith.constant 0 : index
      %c0_55 = arith.constant 0 : index
      %c0_56 = arith.constant 0 : index
      %59 = vector.load %arg6[%c0_54, %c0_55, %c0_56] : memref<1x8x128xf32, #tpu.memory_space<vmem>>, vector<1x8x128xf32>
      tpu.vector_store %arg6[%c0_54, %c0_55, %c0_56], %58 {strides = array<i32>} : memref<1x8x128xf32, #tpu.memory_space<vmem>>, vector<1x8x128xf32>,
    } else {
    }
    %c0 = arith.constant 0 : index
    %c0_1 = arith.constant 0 : index
    %c0_2 = arith.constant 0 : index
    %c0_3 = arith.constant 0 : index
    %3 = vector.load %arg2[%c0, %c0_1, %c0_2, %c0_3] : memref<1x1x166x32xf32, #tpu.memory_space<vmem>>, vector<1x1x128x32xf32>
    %4 = vector.shape_cast %3 : vector<1x1x128x32xf32> to vector<128x32xf32>
    %5 = arith.truncf %4 : vector<128x32xf32> to vector<128x32xbf16>
    %c0_4 = arith.constant 0 : index
    %c0_5 = arith.constant 0 : index
    %6 = vector.load %arg7[%c0_4, %c0_5] : memref<128x288xbf16, #tpu.memory_space<vmem>>, vector<128x32xbf16>
    tpu.vector_store %arg7[%c0_4, %c0_5], %5 {strides = array<i32>} : memref<128x288xbf16, #tpu.memory_space<vmem>>, vector<128x32xbf16>,
    %c0_6 = arith.constant 0 : index
    %c0_7 = arith.constant 0 : index
    %c1 = arith.constant 1 : index
    %c0_8 = arith.constant 0 : index
    %7 = vector.load %arg2[%c0_6, %c0_7, %c1, %c0_8] : memref<1x1x166x32xf32, #tpu.memory_space<vmem>>, vector<1x1x128x32xf32>
    %8 = vector.shape_cast %7 : vector<1x1x128x32xf32> to vector<128x32xf32>
    %9 = arith.truncf %8 : vector<128x32xf32> to vector<128x32xbf16>
    %c0_9 = arith.constant 0 : index
    %c32 = arith.constant 32 : index
    %10 = vector.load %arg7[%c0_9, %c32] : memref<128x288xbf16, #tpu.memory_space<vmem>>, vector<128x32xbf16>
    tpu.vector_store %arg7[%c0_9, %c32], %9 {strides = array<i32>} : memref<128x288xbf16, #tpu.memory_space<vmem>>, vector<128x32xbf16>,
    %c0_10 = arith.constant 0 : index
    %c0_11 = arith.constant 0 : index
    %c2 = arith.constant 2 : index
    %c0_12 = arith.constant 0 : index
    %11 = vector.load %arg2[%c0_10, %c0_11, %c2, %c0_12] : memref<1x1x166x32xf32, #tpu.memory_space<vmem>>, vector<1x1x128x32xf32>
    %12 = vector.shape_cast %11 : vector<1x1x128x32xf32> to vector<128x32xf32>
    %13 = arith.truncf %12 : vector<128x32xf32> to vector<128x32xbf16>
    %c0_13 = arith.constant 0 : index
    %c64 = arith.constant 64 : index
    %14 = vector.load %arg7[%c0_13, %c64] : memref<128x288xbf16, #tpu.memory_space<vmem>>, vector<128x32xbf16>
    tpu.vector_store %arg7[%c0_13, %c64], %13 {strides = array<i32>} : memref<128x288xbf16, #tpu.memory_space<vmem>>, vector<128x32xbf16>,
    %c0_14 = arith.constant 0 : index
    %c0_15 = arith.constant 0 : index
    %c18 = arith.constant 18 : index
    %c0_16 = arith.constant 0 : index
    %15 = vector.load %arg2[%c0_14, %c0_15, %c18, %c0_16] : memref<1x1x166x32xf32, #tpu.memory_space<vmem>>, vector<1x1x128x32xf32>
    %16 = vector.shape_cast %15 : vector<1x1x128x32xf32> to vector<128x32xf32>
    %17 = arith.truncf %16 : vector<128x32xf32> to vector<128x32xbf16>
    %c0_17 = arith.constant 0 : index
    %c96 = arith.constant 96 : index
    %18 = vector.load %arg7[%c0_17, %c96] : memref<128x288xbf16, #tpu.memory_space<vmem>>, vector<128x32xbf16>
    tpu.vector_store %arg7[%c0_17, %c96], %17 {strides = array<i32>} : memref<128x288xbf16, #tpu.memory_space<vmem>>, vector<128x32xbf16>,
    %c0_18 = arith.constant 0 : index
    %c0_19 = arith.constant 0 : index
    %c19 = arith.constant 19 : index
    %c0_20 = arith.constant 0 : index
    %19 = vector.load %arg2[%c0_18, %c0_19, %c19, %c0_20] : memref<1x1x166x32xf32, #tpu.memory_space<vmem>>, vector<1x1x128x32xf32>
    %20 = vector.shape_cast %19 : vector<1x1x128x32xf32> to vector<128x32xf32>
    %21 = arith.truncf %20 : vector<128x32xf32> to vector<128x32xbf16>
    %c0_21 = arith.constant 0 : index
    %c128 = arith.constant 128 : index
    %22 = vector.load %arg7[%c0_21, %c128] : memref<128x288xbf16, #tpu.memory_space<vmem>>, vector<128x32xbf16>
    tpu.vector_store %arg7[%c0_21, %c128], %21 {strides = array<i32>} : memref<128x288xbf16, #tpu.memory_space<vmem>>, vector<128x32xbf16>,
    %c0_22 = arith.constant 0 : index
    %c0_23 = arith.constant 0 : index
    %c20 = arith.constant 20 : index
    %c0_24 = arith.constant 0 : index
    %23 = vector.load %arg2[%c0_22, %c0_23, %c20, %c0_24] : memref<1x1x166x32xf32, #tpu.memory_space<vmem>>, vector<1x1x128x32xf32>
    %24 = vector.shape_cast %23 : vector<1x1x128x32xf32> to vector<128x32xf32>
    %25 = arith.truncf %24 : vector<128x32xf32> to vector<128x32xbf16>
    %c0_25 = arith.constant 0 : index
    %c160 = arith.constant 160 : index
    %26 = vector.load %arg7[%c0_25, %c160] : memref<128x288xbf16, #tpu.memory_space<vmem>>, vector<128x32xbf16>
    tpu.vector_store %arg7[%c0_25, %c160], %25 {strides = array<i32>} : memref<128x288xbf16, #tpu.memory_space<vmem>>, vector<128x32xbf16>,
    %c0_26 = arith.constant 0 : index
    %c0_27 = arith.constant 0 : index
    %c36 = arith.constant 36 : index
    %c0_28 = arith.constant 0 : index
    %27 = vector.load %arg2[%c0_26, %c0_27, %c36, %c0_28] : memref<1x1x166x32xf32, #tpu.memory_space<vmem>>, vector<1x1x128x32xf32>
    %28 = vector.shape_cast %27 : vector<1x1x128x32xf32> to vector<128x32xf32>
    %29 = arith.truncf %28 : vector<128x32xf32> to vector<128x32xbf16>
    %c0_29 = arith.constant 0 : index
    %c192 = arith.constant 192 : index
    %30 = vector.load %arg7[%c0_29, %c192] : memref<128x288xbf16, #tpu.memory_space<vmem>>, vector<128x32xbf16>
    tpu.vector_store %arg7[%c0_29, %c192], %29 {strides = array<i32>} : memref<128x288xbf16, #tpu.memory_space<vmem>>, vector<128x32xbf16>,
    %c0_30 = arith.constant 0 : index
    %c0_31 = arith.constant 0 : index
    %c37 = arith.constant 37 : index
    %c0_32 = arith.constant 0 : index
    %31 = vector.load %arg2[%c0_30, %c0_31, %c37, %c0_32] : memref<1x1x166x32xf32, #tpu.memory_space<vmem>>, vector<1x1x128x32xf32>
    %32 = vector.shape_cast %31 : vector<1x1x128x32xf32> to vector<128x32xf32>
    %33 = arith.truncf %32 : vector<128x32xf32> to vector<128x32xbf16>
    %c0_33 = arith.constant 0 : index
    %c224 = arith.constant 224 : index
    %34 = vector.load %arg7[%c0_33, %c224] : memref<128x288xbf16, #tpu.memory_space<vmem>>, vector<128x32xbf16>
    tpu.vector_store %arg7[%c0_33, %c224], %33 {strides = array<i32>} : memref<128x288xbf16, #tpu.memory_space<vmem>>, vector<128x32xbf16>,
    %c0_34 = arith.constant 0 : index
    %c0_35 = arith.constant 0 : index
    %c38 = arith.constant 38 : index
    %c0_36 = arith.constant 0 : index
    %35 = vector.load %arg2[%c0_34, %c0_35, %c38, %c0_36] : memref<1x1x166x32xf32, #tpu.memory_space<vmem>>, vector<1x1x128x32xf32>
    %36 = vector.shape_cast %35 : vector<1x1x128x32xf32> to vector<128x32xf32>
    %37 = arith.truncf %36 : vector<128x32xf32> to vector<128x32xbf16>
    %c0_37 = arith.constant 0 : index
    %c256 = arith.constant 256 : index
    %38 = vector.load %arg7[%c0_37, %c256] : memref<128x288xbf16, #tpu.memory_space<vmem>>, vector<128x32xbf16>
    tpu.vector_store %arg7[%c0_37, %c256], %37 {strides = array<i32>} : memref<128x288xbf16, #tpu.memory_space<vmem>>, vector<128x32xbf16>,
    %c0_38 = arith.constant 0 : index
    %c0_39 = arith.constant 0 : index
    %39 = vector.load %arg7[%c0_38, %c0_39] : memref<128x288xbf16, #tpu.memory_space<vmem>>, vector<128x288xbf16>
    %c0_40 = arith.constant 0 : index
    %c0_41 = arith.constant 0 : index
    %40 = vector.load %arg4[%c0_40, %c0_41] : memref<288x128xbf16, #tpu.memory_space<vmem>>, vector<288x128xbf16>
    %cst = arith.constant dense<0.000000e+00> : vector<128x128xf32>
    %41 = tpu.matmul %39, %40, %cst {dimension_numbers = #tpu.dot_dimension_numbers<[1], [0], [0], [1], [0, 0, 1, 1], [], []>} : vector<128x288xbf16>, vector<288x128xbf16>, vector<128x128xf32> -> vector<128x128xf32>
    %c0_42 = arith.constant 0 : index
    %c0_43 = arith.constant 0 : index
    %c0_44 = arith.constant 0 : index
    %42 = vector.load %arg3[%c0_42, %c0_43, %c0_44] : memref<1x128x1xf32, #tpu.memory_space<vmem>>, vector<1x128x1xf32>
    %43 = vector.shape_cast %42 : vector<1x128x1xf32> to vector<128x1xf32>
    %44 = vector.broadcast %43 : vector<128x1xf32> to vector<128x128xf32>
    %45 = arith.mulf %41, %44 : vector<128x128xf32>
    %cst_45 = arith.constant dense<0.000000e+00> : vector<128xf32>
    %46 = vector.multi_reduction <add>, %45, %cst_45 [0] : vector<128x128xf32> to vector<128xf32>
    %47 = vector.shape_cast %46 : vector<128xf32> to vector<1x128xf32>
    %c0_46 = arith.constant 0 : index
    %c0_47 = arith.constant 0 : index
    %c0_48 = arith.constant 0 : index
    %48 = vector.load %arg6[%c0_46, %c0_47, %c0_48] : memref<1x8x128xf32, #tpu.memory_space<vmem>>, vector<1x8x128xf32>
    %49 = vector.shape_cast %48 : vector<1x8x128xf32> to vector<8x128xf32>
    %50 = vector.broadcast %47 : vector<1x128xf32> to vector<8x128xf32>
    %51 = arith.addf %49, %50 : vector<8x128xf32>
    %c0_49 = arith.constant 0 : index
    %c0_50 = arith.constant 0 : index
    %c0_51 = arith.constant 0 : index
    %52 = vector.load %arg6[%c0_49, %c0_50, %c0_51] : memref<1x8x128xf32, #tpu.memory_space<vmem>>, vector<1x8x128xf32>
    %53 = vector.shape_cast %52 : vector<1x8x128xf32> to vector<8x128xf32>
    %54 = vector.shape_cast %51 : vector<8x128xf32> to vector<1x8x128xf32>
    tpu.vector_store %arg6[%c0_49, %c0_50, %c0_51], %54 {strides = array<i32>} : memref<1x8x128xf32, #tpu.memory_space<vmem>>, vector<1x8x128xf32>,
    %c2_i32 = arith.constant 2 : i32
    %55 = arith.cmpi eq, %arg1, %c2_i32 : i32
    %56 = arith.extui %55 : i1 to i32
    %c0_i32_52 = arith.constant 0 : i32
    %57 = arith.cmpi ne, %56, %c0_i32_52 : i32
    scf.if %57 {
      %c0_53 = arith.constant 0 : index
      %c0_54 = arith.constant 0 : index
      %c0_55 = arith.constant 0 : index
      %58 = vector.load %arg6[%c0_53, %c0_54, %c0_55] : memref<1x8x128xf32, #tpu.memory_space<vmem>>, vector<1x8x128xf32>
      %59 = vector.shape_cast %58 : vector<1x8x128xf32> to vector<8x128xf32>
      %cst_56 = arith.constant 3.906250e-03 : f32
      %60 = vector.broadcast %cst_56 : f32 to vector<8x128xf32>
      %61 = arith.mulf %59, %60 : vector<8x128xf32>
      %c0_57 = arith.constant 0 : index
      %c0_58 = arith.constant 0 : index
      %62 = vector.load %arg5[%c0_57, %c0_58] : memref<1x128xf32, #tpu.memory_space<vmem>>, vector<1x128xf32>
      %63 = vector.broadcast %62 : vector<1x128xf32> to vector<8x128xf32>
      %64 = arith.addf %61, %63 : vector<8x128xf32>
      %65 = arith.negf %64 : vector<8x128xf32>
      %66 = math.exp %65 : vector<8x128xf32>
      %cst_59 = arith.constant 1.000000e+00 : f32
      %67 = vector.broadcast %cst_59 : f32 to vector<8x128xf32>
      %68 = arith.addf %67, %66 : vector<8x128xf32>
      %69 = arith.divf %67, %68 : vector<8x128xf32>
      %c0_60 = arith.constant 0 : index
      %c0_61 = arith.constant 0 : index
      %c0_62 = arith.constant 0 : index
      %70 = vector.load %arg6[%c0_60, %c0_61, %c0_62] : memref<1x8x128xf32, #tpu.memory_space<vmem>>, vector<1x8x128xf32>
      %71 = vector.shape_cast %70 : vector<1x8x128xf32> to vector<8x128xf32>
      %72 = vector.shape_cast %69 : vector<8x128xf32> to vector<1x8x128xf32>
      tpu.vector_store %arg6[%c0_60, %c0_61, %c0_62], %72 {strides = array<i32>} : memref<1x8x128xf32, #tpu.memory_space<vmem>>, vector<1x8x128xf32>,
    } else {
    }
    return
  }
  func.func @transform_0(%arg0: i32, %arg1: i32) -> (i32, i32, i32, i32) {
    %c0_i32 = arith.constant 0 : i32
    %c0_i32_0 = arith.constant 0 : i32
    %c0_i32_1 = arith.constant 0 : i32
    return %arg0, %arg1, %c0_i32, %c0_i32_0 : i32, i32, i32, i32
  }
  func.func @transform_1(%arg0: i32, %arg1: i32) -> (i32, i32, i32) {
    %c0_i32 = arith.constant 0 : i32
    %c0_i32_0 = arith.constant 0 : i32
    %c0_i32_1 = arith.constant 0 : i32
    return %arg1, %c0_i32, %c0_i32_0 : i32, i32, i32
  }
  func.func @transform_2(%arg0: i32, %arg1: i32) -> (i32, i32) {
    %c0_i32 = arith.constant 0 : i32
    %c0_i32_0 = arith.constant 0 : i32
    %c0_i32_1 = arith.constant 0 : i32
    return %c0_i32, %c0_i32_0 : i32, i32
  }
  func.func @transform_3(%arg0: i32, %arg1: i32) -> (i32, i32) {
    %c0_i32 = arith.constant 0 : i32
    %c0_i32_0 = arith.constant 0 : i32
    %c0_i32_1 = arith.constant 0 : i32
    return %c0_i32, %c0_i32_0 : i32, i32
  }
  func.func @transform_4(%arg0: i32, %arg1: i32) -> (i32, i32, i32) {
    %c0_i32 = arith.constant 0 : i32
    %c0_i32_0 = arith.constant 0 : i32
    %c0_i32_1 = arith.constant 0 : i32
    return %arg0, %c0_i32, %c0_i32_0 : i32, i32, i32
  }
}

</mosaic_0001>

<bundles_post_ra>
// kernel: tpu_custom_call.1
= control target key start
LH: loop header
LB: loop body
LE: loop exit
PB: predicated region body
PF: predicated region fallthrough
CT: control target
= control target key end

     0   :  { %9 = vsyncpa [#allocation4], 0  ;;  %s2269_s0 = inlined_call_operand.vmem [shape: f32[2,3,166,32], index: 0, kind: input, shape index: {}]   ;;  %s2270_s1 = inlined_call_operand.vmem [shape: f32[3,128,1], index: 1, kind: input, shape index: {}]   ;;  %s2271_s2 = inlined_call_operand.vmem [shape: bf16[288,128], index: 2, kind: input, shape index: {}]   ;;  %s2272_s3 = inlined_call_operand.vmem [shape: f32[1,128], index: 3, kind: input, shape index: {}]   ;;  %s2273_s4 = inlined_call_operand.hbm [shape: f32[2,8,128], index: 4, kind: output, shape index: {}]  }
   0x1   :  { %11 = vsyncpa [#allocation4 + $0x1], 0  ;;  %s1763_s15 = smov 0   ;;  %s1765_s16 = smov 0  }
   0x2   :  { %s1767_s17 = smov 0   ;;  %s1769_s18 = smov 0  }
   0x3   :  { %s1771_s19 = smov 0   ;;  %s1773_s20 = smov 0  }
   0x4   :  { %s1775_s21 = smov 0   ;;  %s1777_s22 = smov 0  }
   0x5 LB: > { %2276 = sst [smem:[#allocation6_spill]] %s1726_s21  ;;  %s1380_s23 = sadd.s32 4294967295, %s1730_s22   ;;  %s1730_s22 = sphi %s1777_s22, %s17_s22   ;;  %s1726_s21 = sphi %s1775_s21, %s2283_s21   ;;  %s1722_s20 = sphi %s1773_s20, %s2288_s20   ;;  %s1718_s19 = sphi %s1771_s19, %s2281_s19   ;;  %s1714_s18 = sphi %s1769_s18, %s2287_s18   ;;  %s1710_s17 = sphi %s1767_s17, %s2286_s17   ;;  %s1706_s16 = sphi %s1765_s16, %s2285_s16   ;;  %s1702_s15 = sphi %s1763_s15, %s2284_s15  }
   0x6   : > { %s1381_s24 = sadd.s32 4294967294, %s1730_s22   ;;  %s26_s25 = sadd.s32 1, %s1722_s20 }
   0x7   : > { %p27_p0 = scmp.ge.s32.totalorder %s26_s25, 3  ;;  %s29_s26 = sadd.s32 1, %s1726_s21 }
   0x8   : > { %p142_p1 = scmp.ne.s32.totalorder %s1710_s17, %s1706_s16  ;;  %p143_p2 = scmp.eq.s32.totalorder %s1380_s23, 5 }
   0x9   : > { %s2290_s25 = smov (%p27_p0, %s26_s25), 0  ;;  %s2292_s26 = smov (!%p27_p0, %s29_s26), %s1726_s21 }
   0xa   : > { %2277 = sst [smem:[#allocation7_spill]] %s2290_s25  ;;  %p1812_p3 = por %p143_p2, %p142_p1 }
   0xb   : > { %p148_p4 = scmp.ne.s32.totalorder %s1706_s16, %s1702_s15  ;;  %p31_p5 = scmp.ge.s32.totalorder %s2292_s26, 2 }
   0xc   : > { %p149_p6 = scmp.eq.s32.totalorder %s1381_s24, 5  ;;  %p1384_p7 = scmp.ge.s32.totalorder %s1730_s22, 1 }
   0xd   : > { %p193_p8 = scmp.lt.s32.totalorder %s1730_s22, 7  ;;  %s2294_s26 = smov (%p31_p5, %s2292_s26), 0 }
   0xe   : > { %2279 = sst [smem:[#allocation8_spill]] %s2294_s26  ;;  %p1822_p9 = por %p149_p6, %p148_p4 }
   0xf   : > { %p194_p10 = pnand %p1384_p7, %p193_p8  ;;  %s129_s29 = ssub.s32 %s1726_s21, %s2294_s26 }
  0x10   : > { %s132_s30 = sadd.s32 1, %s1710_s17  ;;  %p130_p11 = scmp.eq.s32.totalorder %s129_s29, 0 }
  0x11   : > { %197 = sbr.rel (%p194_p10) target bundleno = 563 (0x233), region = 36  ;;  %s225_s6 = sand.u32 (!%p194_p10), 1, %s1706_s16  }
  0x12   : > { %s1830_s5 = scalar_select %p130_p11, %s1710_s17, %s132_s30  }
  0x13   : > { %p228_p12 = scmp.lt.s32.totalorder (!%p194_p10), %s1718_s19, 1  ;;  %s1385_s7 = sshll.u32 (!%p194_p10), %s225_s6, 3 }
  0x14   : > { %p230_p13 = scmp.lt.s32.totalorder (!%p194_p10), %s1714_s18, 2  ;;  %s1849_s21 = scalar_lea.vmem (!%p194_p10), [#allocation3], %s1385_s7 }
  0x15   : > { %p1389_p0 = scmp.ne.s32.totalorder (!%p194_p10), %s1714_s18, 0 }
  0x18   : > { %s229_s8 = scalar_select %p228_p12, %s1718_s19, 1 }
  0x19   : > { %s231_s9 = scalar_select %p230_p13, %s1714_s18, 2 }
  0x1a   : > { %s1535_s10 = smul.u32 63, %s229_s8  ;;  %v1732_v0 = vmov (!%p1389_p0), 0.0  }
  0x1b   : > { %s1534_s11 = smul.u32 21, %s231_s9  ;;  %s1423_s12 = sshll.u32 %s231_s9, 7  ;;  %247 = vst [vmem:[%s1849_s21] sm:$0xff] (!%p1389_p0), %v1732_v0 }
  0x1c   : > { %s1842_s23 = scalar_lea.vmem %s2270_s1, %s1423_s12  ;;  %246 = sbr.rel (%p1389_p0) target bundleno = 35 (0x23), region = 40 }
  0x1d   : > { %s234_s24 = sadd.s32 %s1535_s10, %s1534_s11 }
  0x1e   : > { %s1386_s29 = sshll.u32 %s234_s24, 3 }
  0x1f   : > { %s1847_s25 = scalar_lea.vmem %s2269_s0, %s1386_s29 }
  0x23 PF: > { %v572_v1 = vld [vmem:[%s1847_s25 + $0x24] sm:$0xff]  ;;  %v573_v2 = vld [vmem:[%s1847_s25 + $0x2c] sm:$0xff]  ;;  %v508_v3 = vld [vmem:[%s1847_s25 + $0x14] sm:$0xff]  ;;  %s1733_s26 = smov 64   ;;  %s1734_s7 = smov 32   ;;  %vm272_vm0 = vcmask 261120  }
  0x24   : > { %v588_v4 = vpack.c.bf16 %v573_v2, %v572_v1  ;;  %v509_v5 = vld [vmem:[%s1847_s25 + $0x1c] sm:$0xff]  ;;  %v347_v7 = vld [vmem:[%s1847_s25 + $0xa] sm:$0xff]  ;;  %v411_v13 = vld [vmem:[%s1847_s25 + $0x12] sm:$0xff]  ;;  %s1735_s8 = smov 96   ;;  %vm337_vm1 = vcmask 523520   ;;  %vm402_vm2 = vcmask 785920  }
  0x25   : > { %v346_v6 = vld [vmem:[%s1847_s25 + $0x2] sm:$0xff]  ;;  %v524_v8 = vpack.c.bf16 %v509_v5, %v508_v3  ;;  %v412_v14 = vld [vmem:[%s1847_s25 + $0x1a] sm:$0xff]  ;;  %v637_v16 = vld [vmem:[%s1847_s25 + $0x2d] sm:$0xff]  ;;  %vm467_vm3 = vcmask 1048320   ;;  %p1416_p1 = scmp.ne.s32.totalorder %s1714_s18, 2 }
  0x26   : > { %v281_v9 = vld [vmem:[%s1847_s25 + $0x1] sm:$0xff]  ;;  %v282_v10 = vld [vmem:[%s1847_s25 + $0x9] sm:$0xff]  ;;  %604 = vrot.lane.b32.xlu1 %v588_v4, %s1733_s26  ;;  %v362_v11 = vpack.c.bf16 %v347_v7, %v346_v6  ;;  %v427_v17 = vpack.c.bf16 %v412_v14, %v411_v13  ;;  %v520_v21 = vld [vmem:[%s1847_s25 + $0x74] sm:$0xff] }
  0x27   : > { %540 = vrot.lane.b32.xlu0 %v524_v8, %s1734_s7  ;;  %v297_v12 = vpack.c.bf16 %v282_v10, %v281_v9  ;;  %v636_v15 = vld [vmem:[%s1847_s25 + $0x25] sm:$0xff]  ;;  %v521_v22 = vld [vmem:[%s1847_s25 + $0x7c] sm:$0xff]  ;;  %v649_v32 = vld [vmem:[%s1847_s25 + $0x8d] sm:$0xff] }
  0x28   : > { %v652_v18 = vpack.c.bf16 %v637_v16, %v636_v15  ;;  %v293_v19 = vld [vmem:[%s1847_s25 + $0x61] sm:$0xff]  ;;  %v294_v20 = vld [vmem:[%s1847_s25 + $0x69] sm:$0xff]  ;;  %v1875_v24 = vpack.c.bf16 %v521_v22, %v520_v21  ;;  %v423_v34 = vld [vmem:[%s1847_s25 + $0x72] sm:$0xff] }
  0x29   : > { %v303_v23 = vpack.c.bf16 %v294_v20, %v293_v19  ;;  %v358_v25 = vld [vmem:[%s1847_s25 + $0x62] sm:$0xff]  ;;  %v359_v26 = vld [vmem:[%s1847_s25 + $0x6a] sm:$0xff]  ;;  %v424_v35 = vld [vmem:[%s1847_s25 + $0x7a] sm:$0xff] }
  0x2a   : > { %378 = vrot.lane.b32.xlu1 %v362_v11, %s1733_s26  ;;  %v584_v27 = vld [vmem:[%s1847_s25 + $0x84] sm:$0xff]  ;;  %v585_v28 = vld [vmem:[%s1847_s25 + $0x8c] sm:$0xff]  ;;  %v1882_v29 = vpack.c.bf16 %v359_v26, %v358_v25  ;;  %v284_v37 = vld [vmem:[%s1847_s25 + $0x19] sm:$0xff]  ;;  %v1899_v38 = vpack.c.bf16 %v424_v35, %v423_v34 }
  0x2b   : > { %313 = vrot.lane.b32.xlu0 %v297_v12, %s1734_s7  ;;  %v1886_v30 = vpack.c.bf16 %v585_v28, %v584_v27  ;;  %v648_v31 = vld [vmem:[%s1847_s25 + $0x85] sm:$0xff]  ;;  %v283_v36 = vld [vmem:[%s1847_s25 + $0x11] sm:$0xff]  ;;  %v575_v40 = vld [vmem:[%s1847_s25 + $0x3c] sm:$0xff] }
  0x2c   : > { %v658_v33 = vpack.c.bf16 %v649_v32, %v648_v31  ;;  %v574_v39 = vld [vmem:[%s1847_s25 + $0x34] sm:$0xff]  ;;  %v1614_v41 = vld [vmem:[%s2271_s2 + $0x40] sm:$0xff]   ;;  %v298_v42 = vpack.c.bf16 %v284_v37, %v283_v36  ;;  %v1616_v44 = vld [vmem:[%s2271_s2 + $0x48] sm:$0xff]  }
  0x2d   : > { %v1615_v43 = vld [vmem:[%s2271_s2] sm:$0xff]   ;;  %1424 = vmatprep.subr.bf16.mxu0 %v1614_v41  ;;  %1518 = vmatprep.subr.bf16.mxu1 %v1614_v41  ;;  %v414_v46 = vld [vmem:[%s1847_s25 + $0x2a] sm:$0xff]  ;;  %v638_v48 = vld [vmem:[%s1847_s25 + $0x35] sm:$0xff]  ;;  %v1925_v50 = vpack.c.bf16 %v575_v40, %v574_v39 }
  0x2e   : > { %443 = vrot.lane.b32.xlu1 %v427_v17, %s1735_s8  ;;  %v413_v45 = vld [vmem:[%s1847_s25 + $0x22] sm:$0xff]  ;;  %1425 = vmatpush3.bf16.msra.mxu0 %v1615_v43  ;;  %v1618_v49 = vld [vmem:[%s2271_s2 + $0x50] sm:$0xff]   ;;  %v1620_v54 = vld [vmem:[%s2271_s2 + $0x58] sm:$0xff]  }
  0x2f   : > { %668 = vrot.lane.b32.xlu0 %v652_v18, %s1735_s8  ;;  %v1617_v47 = vld [vmem:[%s2271_s2 + $0x8] sm:$0xff]   ;;  %1526 = vmatpush3.bf16.msra.mxu1 %v1615_v43  ;;  %v639_v51 = vld [vmem:[%s1847_s25 + $0x3d] sm:$0xff]  ;;  %v1619_v52 = vld [vmem:[%s2271_s2 + $0x10] sm:$0xff]   ;;  %v1937_v56 = vpack.c.bf16 %v414_v46, %v413_v45 }
  0x30   : > { %1426 = vmatprep.subr.bf16.mxu0 %v1616_v44  ;;  %1519 = vmatprep.subr.bf16.mxu1 %v1616_v44  ;;  %v295_v53 = vld [vmem:[%s1847_s25 + $0x71] sm:$0xff]  ;;  %v477_v57 = vld [vmem:[%s1847_s25 + $0x1b] sm:$0xff]  ;;  %v653_v58 = vpack.c.bf16 %v639_v51, %v638_v48  ;;  %v249_v62 = vld [vmem:[%s1847_s25 + $0x8] sm:$0xff] }
  0x31   : > { %v476_v55 = vld [vmem:[%s1847_s25 + $0x13] sm:$0xff]  ;;  %v248_v61 = vld [vmem:[%s1847_s25] sm:$0xff]  ;;  %v1624_v6 = vld [vmem:[%s2271_s2 + $0x68] sm:$0xff]  }
  0x32   : > { %325 = vrot.lane.b32.xlu1 %v303_v23, %s1734_s7  ;;  %1427 = vmatpush3.bf16.msra.mxu0 %v1617_v47  ;;  %v296_v59 = vld [vmem:[%s1847_s25 + $0x79] sm:$0xff]  ;;  %v492_v60 = vpack.c.bf16 %v477_v57, %v476_v55  ;;  %v264_v0 = vpack.c.bf16 %v249_v62, %v248_v61  ;;  %v261_v10 = vld [vmem:[%s1847_s25 + $0x68] sm:$0xff]  ;;  %v250_v23 = vld [vmem:[%s1847_s25 + $0x10] sm:$0xff] }
  0x33   : > { %552 = vrot.lane.b32.xlu0 %v1875_v24, %s1734_s7  ;;  %1527 = vmatpush3.bf16.msra.mxu1 %v1617_v47  ;;  %v1621_v63 = vld [vmem:[%s2271_s2 + $0x18] sm:$0xff]   ;;  %v304_v1 = vpack.c.bf16 %v296_v59, %v295_v53  ;;  %v1623_v5 = vld [vmem:[%s2271_s2 + $0x20] sm:$0xff]   ;;  %v1625_v15 = vld [vmem:[%s2271_s2 + $0x28] sm:$0xff]  }
  0x34   : > { %1428 = vmatprep.subr.bf16.mxu0 %v1618_v49  ;;  %1520 = vmatprep.subr.bf16.mxu1 %v1618_v49  ;;  %500 = vst.msk [vmem:[#allocation2 + $0x8] sm:$0xff] %vm272_vm0, %v492_v60  ;;  %v586_v2 = vld [vmem:[%s1847_s25 + $0x94] sm:$0xff]  ;;  %v587_v3 = vld [vmem:[%s1847_s25 + $0x9c] sm:$0xff]  ;;  %273 = vst.msk [vmem:[#allocation2] sm:$0xff] %vm272_vm0, %v264_v0 }
  0x35   : > { %v650_v7 = vld [vmem:[%s1847_s25 + $0x95] sm:$0xff]  ;;  %v651_v8 = vld [vmem:[%s1847_s25 + $0x9d] sm:$0xff]  ;;  %v595_v14 = vpack.c.bf16 %v587_v3, %v586_v2  ;;  %v479_v19 = vld [vmem:[%s1847_s25 + $0x2b] sm:$0xff] }
  0x36   : > { %390 = vrot.lane.b32.xlu1 %v1882_v29, %s1733_s26  ;;  %1429 = vmatpush3.bf16.msra.mxu0 %v1619_v52  ;;  %v260_v9 = vld [vmem:[%s1847_s25 + $0x60] sm:$0xff]  ;;  %v488_v11 = vld [vmem:[%s1847_s25 + $0x73] sm:$0xff]  ;;  %v426_v21 = vld [vmem:[%s1847_s25 + $0x8a] sm:$0xff]  ;;  %v659_v27 = vpack.c.bf16 %v651_v8, %v650_v7 }
  0x37   : > { %616 = vrot.lane.b32.xlu0 %v1886_v30, %s1733_s26  ;;  %1528 = vmatpush3.bf16.msra.mxu1 %v1619_v52  ;;  %v270_v12 = vpack.c.bf16 %v261_v10, %v260_v9  ;;  %v489_v13 = vld [vmem:[%s1847_s25 + $0x7b] sm:$0xff]  ;;  %v478_v18 = vld [vmem:[%s1847_s25 + $0x23] sm:$0xff]  ;;  %v262_v26 = vld [vmem:[%s1847_s25 + $0x70] sm:$0xff] }
  0x38   : > { %1430 = vmatprep.subr.bf16.mxu0 %v1620_v54  ;;  %1521 = vmatprep.subr.bf16.mxu1 %v1620_v54  ;;  %v498_v16 = vpack.c.bf16 %v489_v13, %v488_v11  ;;  %v1983_v20 = vld [vmem:[%s1847_s25 + $0x82] sm:$0xff]  ;;  %v493_v22 = vpack.c.bf16 %v479_v19, %v478_v18  ;;  %v251_v25 = vld [vmem:[%s1847_s25 + $0x18] sm:$0xff]  ;;  %v491_v34 = vld [vmem:[%s1847_s25 + $0x8b] sm:$0xff] }
  0x39   : > { %279 = vst.msk [vmem:[#allocation2 + $0x90] sm:$0xff] %vm272_vm0, %v270_v12  ;;  %v285_v28 = vld [vmem:[%s1847_s25 + $0x21] sm:$0xff]  ;;  %v265_v31 = vpack.c.bf16 %v251_v25, %v250_v23  ;;  %v263_v32 = vld [vmem:[%s1847_s25 + $0x78] sm:$0xff]  ;;  %v1627_v35 = vld [vmem:[%s2271_s2 + $0x30] sm:$0xff]   ;;  %v434_v45 = vpack.c.bf16 %v426_v21, %v1983_v20 }
  0x3a   : > { %680 = vrot.lane.b32.xlu1 %v658_v33, %s1735_s8  ;;  %1431 = vmatpush3.bf16.msra.mxu0 %v1621_v63  ;;  %506 = vst.msk [vmem:[#allocation2 + $0x98] sm:$0xff] %vm272_vm0, %v498_v16  ;;  %v490_v33 = vld [vmem:[%s1847_s25 + $0x83] sm:$0xff]  ;;  %501 = vst.msk [vmem:[#allocation2 + $0x20] sm:$0xff] %vm272_vm0, %v493_v22  ;;  %v271_v36 = vpack.c.bf16 %v263_v32, %v262_v26  ;;  %v481_v39 = vld [vmem:[%s1847_s25 + $0x3b] sm:$0xff] }
  0x3b   : > { %542 = vrot.lane.b32.xlu0 %v588_v4, %s1734_s7  ;;  %v1622_v4 = vld [vmem:[%s2271_s2 + $0x60] sm:$0xff]   ;;  %1529 = vmatpush3.bf16.msra.mxu1 %v1621_v63  ;;  %v499_v37 = vpack.c.bf16 %v491_v34, %v490_v33  ;;  %274 = vst.msk [vmem:[#allocation2 + $0x18] sm:$0xff] %vm272_vm0, %v265_v31  ;;  %v1628_v43 = vld [vmem:[%s2271_s2 + $0x78] sm:$0xff]   ;;  %v483_v48 = vld [vmem:[%s1847_s25 + $0x4b] sm:$0xff] }
  0x3c   : > { %1432 = vmatprep.subr.bf16.mxu0 %v1622_v4  ;;  %1522 = vmatprep.subr.bf16.mxu1 %v1622_v4  ;;  %v252_v40 = vld [vmem:[%s1847_s25 + $0x20] sm:$0xff]  ;;  %280 = vst.msk [vmem:[#allocation2 + $0xa8] sm:$0xff] %vm272_vm0, %v271_v36  ;;  %v254_v53 = vld [vmem:[%s1847_s25 + $0x30] sm:$0xff]  ;;  %v255_v54 = vld [vmem:[%s1847_s25 + $0x38] sm:$0xff] }
  0x3d   : > { %507 = vst.msk [vmem:[#allocation2 + $0xb0] sm:$0xff] %vm272_vm0, %v499_v37  ;;  %v576_v46 = vld [vmem:[%s1847_s25 + $0x44] sm:$0xff]  ;;  %v701_v55 = vld [vmem:[%s1847_s25 + $0x2e] sm:$0xff]  ;;  %v702_v60 = vld [vmem:[%s1847_s25 + $0x36] sm:$0xff] }
  0x3e   : > { %455 = vrot.lane.b32.xlu1 %v1899_v38, %s1735_s8  ;;  %1433 = vmatpush3.bf16.msra.mxu0 %v1623_v5  ;;  %v482_v47 = vld [vmem:[%s1847_s25 + $0x43] sm:$0xff]  ;;  %v577_v57 = vld [vmem:[%s1847_s25 + $0x4c] sm:$0xff]  ;;  %v416_v4 = vld [vmem:[%s1847_s25 + $0x3a] sm:$0xff] }
  0x3f   : > { %315 = vrot.lane.b32.xlu0 %v298_v42, %s1734_s7  ;;  %1530 = vmatpush3.bf16.msra.mxu1 %v1623_v5  ;;  %v253_v42 = vld [vmem:[%s1847_s25 + $0x28] sm:$0xff]  ;;  %v495_v52 = vpack.c.bf16 %v483_v48, %v482_v47  ;;  %v703_v61 = vld [vmem:[%s1847_s25 + $0x3e] sm:$0xff]  ;;  %v415_v62 = vld [vmem:[%s1847_s25 + $0x32] sm:$0xff]  ;;  %v590_v3 = vpack.c.bf16 %v577_v57, %v576_v46 }
  0x40   : > { %1434 = vmatprep.subr.bf16.mxu0 %v1624_v6  ;;  %1523 = vmatprep.subr.bf16.mxu1 %v1624_v6  ;;  %v266_v44 = vpack.c.bf16 %v253_v42, %v252_v40  ;;  %v700_v49 = vld [vmem:[%s1847_s25 + $0x26] sm:$0xff]  ;;  %v717_v63 = vpack.c.bf16 %v703_v61, %v702_v60  ;;  %v705_v2 = vld [vmem:[%s1847_s25 + $0x4e] sm:$0xff]  ;;  %v706_v6 = vld [vmem:[%s1847_s25 + $0x56] sm:$0xff]  ;;  %v429_v11 = vpack.c.bf16 %v416_v4, %v415_v62 }
  0x41   : > { %v716_v59 = vpack.c.bf16 %v701_v55, %v700_v49  ;;  %503 = vst.msk [vmem:[#allocation2 + $0x50] sm:$0xff] %vm272_vm0, %v495_v52  ;;  %v2037_v0 = vld [vmem:[%s2271_s2 + $0x80] sm:$0xff]   ;;  %v641_v9 = vld [vmem:[%s1847_s25 + $0x4d] sm:$0xff]  ;;  %v710_v26 = vld [vmem:[%s1847_s25 + $0x76] sm:$0xff] }
  0x42   : > { %380 = vrot.lane.b32.xlu1 %v427_v17, %s1733_s26  ;;  %v1626_v17 = vld [vmem:[%s2271_s2 + $0x70] sm:$0xff]   ;;  %1435 = vmatpush3.bf16.msra.mxu0 %v1625_v15  ;;  %275 = vst.msk [vmem:[#allocation2 + $0x30] sm:$0xff] %vm272_vm0, %v266_v44  ;;  %725 = vst.msk [vmem:[#allocation2 + $0x28] sm:$0xff] %vm272_vm0, %v717_v63  ;;  %v707_v7 = vld [vmem:[%s1847_s25 + $0x5e] sm:$0xff] }
  0x43   : > { %606 = vrot.lane.b32.xlu0 %v1925_v50, %s1733_s26  ;;  %1531 = vmatpush3.bf16.msra.mxu1 %v1625_v15  ;;  %724 = vst.msk [vmem:[#allocation2 + $0x10] sm:$0xff] %vm272_vm0, %v716_v59  ;;  %v640_v8 = vld [vmem:[%s1847_s25 + $0x45] sm:$0xff]  ;;  %v719_v10 = vpack.c.bf16 %v707_v7, %v706_v6  ;;  %v287_v13 = vld [vmem:[%s1847_s25 + $0x31] sm:$0xff]  ;;  %v579_v22 = vld [vmem:[%s1847_s25 + $0x5c] sm:$0xff]  ;;  %v1736_v6 = vmov 0  }
  0x44   : > { %1436 = vmatprep.subr.bf16.mxu0 %v1626_v17  ;;  %1524 = vmatprep.subr.bf16.mxu1 %v1626_v17  ;;  %v654_v12 = vpack.c.bf16 %v641_v9, %v640_v8  ;;  %v484_v16 = vld [vmem:[%s1847_s25 + $0x53] sm:$0xff]  ;;  %v485_v17 = vld [vmem:[%s1847_s25 + $0x5b] sm:$0xff]  ;;  %v257_v20 = vld [vmem:[%s1847_s25 + $0x48] sm:$0xff] }
  0x45   : > { %727 = vst.msk [vmem:[#allocation2 + $0x58] sm:$0xff] %vm272_vm0, %v719_v10  ;;  %v496_v18 = vpack.c.bf16 %v485_v17, %v484_v16  ;;  %v256_v19 = vld [vmem:[%s1847_s25 + $0x40] sm:$0xff]  ;;  %v709_v25 = vld [vmem:[%s1847_s25 + $0x6e] sm:$0xff]  ;;  %v259_v52 = vld [vmem:[%s1847_s25 + $0x58] sm:$0xff]  ;;  %1613 = vset.pattern.permute.xlu1 %v1736_v6  ;;  %1612 = vset.pattern.permute.xlu0 %v1736_v6 }
  0x46   : > { %445 = vrot.lane.b32.xlu1 %v1937_v56, %s1735_s8  ;;  %1437 = vmatpush3.bf16.msra.mxu0 %v1627_v35  ;;  %v708_v21 = vld [vmem:[%s1847_s25 + $0x66] sm:$0xff]  ;;  %v268_v23 = vpack.c.bf16 %v257_v20, %v256_v19  ;;  %v642_v34 = vld [vmem:[%s1847_s25 + $0x55] sm:$0xff]  ;;  %v715_v44 = vld [vmem:[%s1847_s25 + $0x9e] sm:$0xff] }
  0x47   : > { %670 = vrot.lane.b32.xlu0 %v653_v58, %s1735_s8  ;;  %v267_v58 = vpack.c.bf16 %v255_v54, %v254_v53  ;;  %1532 = vmatpush3.bf16.msra.mxu1 %v1627_v35  ;;  %504 = vst.msk [vmem:[#allocation2 + $0x68] sm:$0xff] %vm272_vm0, %v496_v18  ;;  %v417_v32 = vld [vmem:[%s1847_s25 + $0x42] sm:$0xff]  ;;  %v418_v33 = vld [vmem:[%s1847_s25 + $0x4a] sm:$0xff]  ;;  %v420_v59 = vld [vmem:[%s1847_s25 + $0x5a] sm:$0xff] }
  0x48   : > { %1438 = vmatprep.subr.bf16.mxu0 %v1628_v43  ;;  %1525 = vmatprep.subr.bf16.mxu1 %v1628_v43  ;;  %277 = vst.msk [vmem:[#allocation2 + $0x60] sm:$0xff] %vm272_vm0, %v268_v23  ;;  %v643_v35 = vld [vmem:[%s1847_s25 + $0x5d] sm:$0xff]  ;;  %v430_v36 = vpack.c.bf16 %v418_v33, %v417_v32  ;;  %v487_v48 = vld [vmem:[%s1847_s25 + $0x6b] sm:$0xff] }
  0x49   : > { %276 = vst.msk [vmem:[#allocation2 + $0x48] sm:$0xff] %vm272_vm0, %v267_v58  ;;  %v289_v37 = vld [vmem:[%s1847_s25 + $0x41] sm:$0xff]  ;;  %v655_v40 = vpack.c.bf16 %v643_v35, %v642_v34  ;;  %v714_v43 = vld [vmem:[%s1847_s25 + $0x96] sm:$0xff]  ;;  %v581_v54 = vld [vmem:[%s1847_s25 + $0x6c] sm:$0xff] }
  0x4a   : > { %327 = vrot.lane.b32.xlu1 %v304_v1, %s1734_s7  ;;  %v704_v1 = vld [vmem:[%s1847_s25 + $0x46] sm:$0xff]  ;;  %v419_v58 = vld [vmem:[%s1847_s25 + $0x52] sm:$0xff]  ;;  %v647_v4 = vld [vmem:[%s1847_s25 + $0x7d] sm:$0xff] }
  0x4b   : > { %554 = vrot.lane.b32.xlu0 %v1886_v30, %s1734_s7  ;;  %v286_v30 = vld [vmem:[%s1847_s25 + $0x29] sm:$0xff]  ;;  %v718_v5 = vpack.c.bf16 %v705_v2, %v704_v1  ;;  %v431_v62 = vpack.c.bf16 %v420_v59, %v419_v58  ;;  %v291_v63 = vld [vmem:[%s1847_s25 + $0x51] sm:$0xff]  ;;  %v292_v1 = vld [vmem:[%s1847_s25 + $0x59] sm:$0xff] }
  0x4c   : > { %v299_v51 = vpack.c.bf16 %v286_v30, %v285_v28  ;;  %v711_v28 = vld [vmem:[%s1847_s25 + $0x7e] sm:$0xff]  ;;  %v645_v61 = vld [vmem:[%s1847_s25 + $0x6d] sm:$0xff]  ;;  %v302_v2 = vpack.c.bf16 %v292_v1, %v291_v63 }
  0x4d   : > { %726 = vst.msk [vmem:[#allocation2 + $0x40] sm:$0xff] %vm272_vm0, %v718_v5  ;;  %v721_v30 = vpack.c.bf16 %v711_v28, %v710_v26  ;;  %v486_v47 = vld [vmem:[%s1847_s25 + $0x63] sm:$0xff]  ;;  %v1120_v9 = vld [vmem:[%s1842_s23 + $0x10] sm:$0xff]  ;;  %v1129_v16 = vld [vmem:[%s1842_s23 + $0x58] sm:$0xff] }
  0x4e   : > { %392 = vrot.lane.b32.xlu1 %v1899_v38, %s1733_s26  ;;  %v480_v38 = vld [vmem:[%s1847_s25 + $0x33] sm:$0xff]  ;;  %v497_v49 = vpack.c.bf16 %v487_v48, %v486_v47  ;;  %v580_v53 = vld [vmem:[%s1847_s25 + $0x64] sm:$0xff] }
  0x4f   : > { %618 = vrot.lane.b32.xlu0 %v595_v14, %s1733_s26  ;;  %v494_v41 = vpack.c.bf16 %v481_v39, %v480_v38  ;;  %v288_v14 = vld [vmem:[%s1847_s25 + $0x39] sm:$0xff]  ;;  %729 = vst.msk [vmem:[#allocation2 + $0x88] sm:$0xff] %vm272_vm0, %v721_v30  ;;  %v712_v38 = vld [vmem:[%s1847_s25 + $0x86] sm:$0xff]  ;;  %v713_v39 = vld [vmem:[%s1847_s25 + $0x8e] sm:$0xff]  ;;  %v592_v57 = vpack.c.bf16 %v581_v54, %v580_v53 }
  0x50   : > { %v300_v15 = vpack.c.bf16 %v288_v14, %v287_v13  ;;  %v722_v42 = vpack.c.bf16 %v713_v39, %v712_v38  ;;  %505 = vst.msk [vmem:[#allocation2 + $0x80] sm:$0xff] %vm272_vm0, %v497_v49  ;;  %v644_v60 = vld [vmem:[%s1847_s25 + $0x65] sm:$0xff]  ;;  %v734_v59 = vld [vmem:[#allocation2 + $0x10] sm:$0xff] }
  0x51   : > { %502 = vst.msk [vmem:[#allocation2 + $0x38] sm:$0xff] %vm272_vm0, %v494_v41  ;;  %v290_v41 = vld [vmem:[%s1847_s25 + $0x49] sm:$0xff]  ;;  %v1118_v8 = vld [vmem:[%s1842_s23] sm:$0xff] }
  0x52   : > { %682 = vrot.lane.b32.xlu1 %v659_v27, %s1735_s8  ;;  %v720_v27 = vpack.c.bf16 %v709_v25, %v708_v21  ;;  %730 = vst.msk [vmem:[#allocation2 + $0xa0] sm:$0xff] %vm272_vm0, %v722_v42  ;;  %v301_v46 = vpack.c.bf16 %v290_v41, %v289_v37  ;;  %v1119_v7 = vld [vmem:[%s1842_s23 + $0x8] sm:$0xff]  ;;  %v1122_v10 = vld [vmem:[%s1842_s23 + $0x20] sm:$0xff]  ;;  %v1133_v25 = vld [vmem:[%s1842_s23 + $0x78] sm:$0xff] }
  0x53   : > { %544 = vrot.lane.b32.xlu0 %v1925_v50, %s1734_s7  ;;  %v1629_v50 = vld [vmem:[%s2271_s2 + $0x38] sm:$0xff]   ;;  %v1126_v13 = vld [vmem:[%s1842_s23 + $0x40] sm:$0xff]  ;;  %v1127_v14 = vld [vmem:[%s1842_s23 + $0x48] sm:$0xff] }
  0x54   : > { %1439 = vmatpush3.bf16.msra.mxu0 %v1629_v50  ;;  %1533 = vmatpush3.bf16.msra.mxu1 %v1629_v50  ;;  %728 = vst.msk [vmem:[#allocation2 + $0x70] sm:$0xff] %vm272_vm0, %v720_v27  ;;  %v656_v50 = vpack.c.bf16 %v645_v61, %v644_v60  ;;  %v1130_v18 = vld [vmem:[%s1842_s23 + $0x60] sm:$0xff]  ;;  %v1131_v20 = vld [vmem:[%s1842_s23 + $0x68] sm:$0xff] }
  0x55   : > { %1498 = vmatprep.subr.bf16.mxu1 %v2037_v0  ;;  %v1631_v41 = vld [vmem:[%s2271_s2 + $0x88] sm:$0xff]  }
  0x56   : > { %457 = vrot.lane.b32.xlu1 %v434_v45, %s1735_s8  ;;  %v723_v45 = vpack.c.bf16 %v715_v44, %v714_v43  ;;  %v737_v1 = vld [vmem:[#allocation2 + $0x28] sm:$0xff] }
  0x57   : > { %317 = vrot.lane.b32.xlu0 %v299_v51, %s1734_s7  ;;  %v258_v51 = vld [vmem:[%s1847_s25 + $0x50] sm:$0xff] }
  0x58   : > { %731 = vst.msk [vmem:[#allocation2 + $0xb8] sm:$0xff] %vm272_vm0, %v723_v45  ;;  %v269_v55 = vpack.c.bf16 %v259_v52, %v258_v51 }
  0x5a   : > { %382 = vrot.lane.b32.xlu1 %v1937_v56, %s1733_s26  ;;  %v578_v56 = vld [vmem:[%s1847_s25 + $0x54] sm:$0xff]  ;;  %278 = vst.msk [vmem:[#allocation2 + $0x78] sm:$0xff] %vm272_vm0, %v269_v55 }
  0x5b   : > { %608 = vrot.lane.b32.xlu0 %v590_v3, %s1733_s26  ;;  %v591_v31 = vpack.c.bf16 %v579_v22, %v578_v56  ;;  %v1132_v22 = vld [vmem:[%s1842_s23 + $0x70] sm:$0xff] }
  0x5e   : > { %447 = vrot.lane.b32.xlu1 %v429_v11, %s1735_s8 }
  0x5f   : > { %672 = vrot.lane.b32.xlu0 %v654_v12, %s1735_s8  ;;  %v1124_v12 = vld [vmem:[%s1842_s23 + $0x30] sm:$0xff] }
  0x62   : > { %319 = vrot.lane.b32.xlu1 %v300_v15, %s1734_s7  ;;  %v1128_v15 = vld [vmem:[%s1842_s23 + $0x50] sm:$0xff] }
  0x63   : > { %546 = vrot.lane.b32.xlu0 %v590_v3, %s1734_s7  ;;  %v646_v3 = vld [vmem:[%s1847_s25 + $0x75] sm:$0xff] }
  0x64   : > { %v657_v5 = vpack.c.bf16 %v647_v4, %v646_v3 }
  0x66   : > { %384 = vrot.lane.b32.xlu1 %v429_v11, %s1733_s26  ;;  %v1123_v11 = vld [vmem:[%s1842_s23 + $0x28] sm:$0xff] }
  0x67   : > { %610 = vrot.lane.b32.xlu0 %v591_v31, %s1733_s26 }
  0x6a   : > { %449 = vrot.lane.b32.xlu1 %v430_v36, %s1735_s8 }
  0x6b   : > { %674 = vrot.lane.b32.xlu0 %v655_v40, %s1735_s8 }
  0x6e   : > { %321 = vrot.lane.b32.xlu1 %v301_v46, %s1734_s7 }
  0x6f   : > { %548 = vrot.lane.b32.xlu0 %v591_v31, %s1734_s7 }
  0x72   : > { %386 = vrot.lane.b32.xlu1 %v430_v36, %s1733_s26 }
  0x73   : > { %612 = vrot.lane.b32.xlu0 %v592_v57, %s1733_s26 }
  0x76   : > { %451 = vrot.lane.b32.xlu1 %v431_v62, %s1735_s8 }
  0x77   : > { %676 = vrot.lane.b32.xlu0 %v656_v50, %s1735_s8 }
  0x7a   : > { %323 = vrot.lane.b32.xlu1 %v302_v2, %s1734_s7  ;;  %v740_v2 = vld [vmem:[#allocation2 + $0x40] sm:$0xff] }
  0x7b   : > { %550 = vrot.lane.b32.xlu0 %v592_v57, %s1734_s7 }
  0x7e   : > { %388 = vrot.lane.b32.xlu1 %v431_v62, %s1733_s26 }
  0x7f   : > { %614 = vrot.lane.b32.xlu0 %v1875_v24, %s1733_s26  ;;  %v1121_v24 = vld [vmem:[%s1842_s23 + $0x18] sm:$0xff] }
  0x82   : > { %453 = vrot.lane.b32.xlu1 %v1882_v29, %s1735_s8  ;;  %v1125_v29 = vld [vmem:[%s1842_s23 + $0x38] sm:$0xff] }
  0x83   : > { %678 = vrot.lane.b32.xlu0 %v657_v5, %s1735_s8 }
  0x86   : > { %1141 = vperm.xlu1 %1613, %v1119_v7  }
  0x87   : > { %1136 = vperm.xlu0 %1612, %v1118_v8  }
  0x8a   : > { %1146 = vperm.xlu1 %1613, %v1120_v9   ;;  %v743_v9 = vld [vmem:[#allocation2 + $0x58] sm:$0xff] }
  0x8b   : > { %1151 = vperm.xlu0 %1612, %v1121_v24   ;;  %v746_v24 = vld [vmem:[#allocation2 + $0x70] sm:$0xff] }
  0x8e   : > { %1156 = vperm.xlu1 %1613, %v1122_v10  }
  0x8f   : > { %1161 = vperm.xlu0 %1612, %v1123_v11  }
  0x92   : > { %1166 = vperm.xlu1 %1613, %v1124_v12  }
  0x93   : > { %1171 = vperm.xlu0 %1612, %v1125_v29  }
  0x96   : > { %1176 = vperm.xlu1 %1613, %v1126_v13  }
  0x97   : > { %1181 = vperm.xlu0 %1612, %v1127_v14  }
  0x98   : > { %v605_v56 = vpop.permute.xlu1 %604 }
  0x99   : > { %v541_v17 = vpop.permute.xlu0 %540 }
  0x9a   : > { %564 = vst.msk [vmem:[#allocation2 + $0x8] sm:$0xff] %vm337_vm1, %v541_v17  ;;  %1186 = vperm.xlu1 %1613, %v1128_v15   ;;  %v749_v15 = vld [vmem:[#allocation2 + $0x88] sm:$0xff] }
  0x9b   : > { %628 = vst.msk [vmem:[#allocation2 + $0x8] sm:$0xff] %vm402_vm2, %v605_v56  ;;  %1191 = vperm.xlu0 %1612, %v1129_v16   ;;  %v752_v56 = vld [vmem:[#allocation2 + $0xa0] sm:$0xff] }
  0x9c   : > { %v379_v19 = vpop.permute.xlu1 %378 }
  0x9d   : > { %v314_v21 = vpop.permute.xlu0 %313 }
  0x9e   : > { %338 = vst.msk [vmem:[#allocation2] sm:$0xff] %vm337_vm1, %v314_v21  ;;  %1196 = vperm.xlu1 %1613, %v1130_v18  }
  0x9f   : > { %403 = vst.msk [vmem:[#allocation2] sm:$0xff] %vm402_vm2, %v379_v19  ;;  %1201 = vperm.xlu0 %1612, %v1131_v20   ;;  %v755_v20 = vld [vmem:[#allocation2 + $0xb8] sm:$0xff] }
  0xa0   : > { %v444_v23 = vpop.permute.xlu1 %443 }
  0xa1   : > { %468 = vst.msk [vmem:[#allocation2] sm:$0xff] %vm467_vm3, %v444_v23  ;;  %v669_v26 = vpop.permute.xlu0 %668 }
  0xa2   : > { %692 = vst.msk [vmem:[#allocation2 + $0x8] sm:$0xff] %vm467_vm3, %v669_v26  ;;  %1206 = vperm.xlu1 %1613, %v1132_v22  }
  0xa3   : > { %1211 = vperm.xlu0 %1612, %v1133_v25  }
  0xa4   : > { %v326_v27 = vpop.permute.xlu1 %325 }
  0xa5   : > { %344 = vst.msk [vmem:[#allocation2 + $0x90] sm:$0xff] %vm337_vm1, %v326_v27  ;;  %v553_v28 = vpop.permute.xlu0 %552 }
  0xa6   : > { %570 = vst.msk [vmem:[#allocation2 + $0x98] sm:$0xff] %vm337_vm1, %v553_v28 }
  0xa8   : > { %v391_v30 = vpop.permute.xlu1 %390  ;;  %v732_v31 = vld [vmem:[#allocation2] sm:$0xff] }
  0xa9   : > { %409 = vst.msk [vmem:[#allocation2 + $0x90] sm:$0xff] %vm402_vm2, %v391_v30  ;;  %v617_v32 = vpop.permute.xlu0 %616  ;;  %v733_v33 = vld [vmem:[#allocation2 + $0x8] sm:$0xff] }
  0xaa   : > { %634 = vst.msk [vmem:[#allocation2 + $0x98] sm:$0xff] %vm402_vm2, %v617_v32  ;;  %956 = vmatprep.mubr.bf16.mxu0 %v733_v33 }
  0xab   : > { %957 = vmatmul.mubr.bf16.vlgmr.msra.gmra.mrb[0].mxu0 %v732_v31 }
  0xac   : > { %v681_v34 = vpop.permute.xlu1 %680 }
  0xad   : > { %698 = vst.msk [vmem:[#allocation2 + $0x98] sm:$0xff] %vm467_vm3, %v681_v34  ;;  %v543_v35 = vpop.permute.xlu0 %542 }
  0xae   : > { %565 = vst.msk [vmem:[#allocation2 + $0x20] sm:$0xff] %vm337_vm1, %v543_v35 }
  0xb0   : > { %v456_v36 = vpop.permute.xlu1 %455 }
  0xb1   : > { %474 = vst.msk [vmem:[#allocation2 + $0x90] sm:$0xff] %vm467_vm3, %v456_v36  ;;  %v316_v37 = vpop.permute.xlu0 %315 }
  0xb2   : > { %339 = vst.msk [vmem:[#allocation2 + $0x18] sm:$0xff] %vm337_vm1, %v316_v37 }
  0xb4   : > { %v381_v38 = vpop.permute.xlu1 %380  ;;  %v751_v39 = vld [vmem:[#allocation2 + $0x98] sm:$0xff] }
  0xb5   : > { %404 = vst.msk [vmem:[#allocation2 + $0x18] sm:$0xff] %vm402_vm2, %v381_v38  ;;  %v607_v40 = vpop.permute.xlu0 %606  ;;  %1004 = vmatprep.mubr.bf16.mxu1 %v751_v39 }
  0xb6   : > { %629 = vst.msk [vmem:[#allocation2 + $0x20] sm:$0xff] %vm402_vm2, %v607_v40 }
  0xb8   : > { %v446_v42 = vpop.permute.xlu1 %445  ;;  %v750_v43 = vld [vmem:[#allocation2 + $0x90] sm:$0xff] }
  0xb9   : > { %469 = vst.msk [vmem:[#allocation2 + $0x18] sm:$0xff] %vm467_vm3, %v446_v42  ;;  %v671_v44 = vpop.permute.xlu0 %670  ;;  %1005 = vmatmul.mubr.bf16.vlgmr.msra.gmra.mrb[0].mxu1 %v750_v43 }
  0xba   : > { %693 = vst.msk [vmem:[#allocation2 + $0x20] sm:$0xff] %vm467_vm3, %v671_v44  ;;  %1499 = vmatpush3.bf16.msra.mxu1 %v2037_v0 }
  0xbb   : > { %1500 = vmatprep.subr.bf16.mxu1 %v1631_v41 }
  0xbc   : > { %v328_v45 = vpop.permute.xlu1 %327 }
  0xbd   : > { %345 = vst.msk [vmem:[#allocation2 + $0xa8] sm:$0xff] %vm337_vm1, %v328_v45  ;;  %v555_v46 = vpop.permute.xlu0 %554 }
  0xbe   : > { %571 = vst.msk [vmem:[#allocation2 + $0xb0] sm:$0xff] %vm337_vm1, %v555_v46  ;;  %1501 = vmatpush3.bf16.msra.mxu1 %v1631_v41 }
  0xc0   : > { %v393_v47 = vpop.permute.xlu1 %392  ;;  %v735_v48 = vld [vmem:[#allocation2 + $0x18] sm:$0xff] }
  0xc1   : > { %410 = vst.msk [vmem:[#allocation2 + $0xa8] sm:$0xff] %vm402_vm2, %v393_v47  ;;  %v619_v49 = vpop.permute.xlu0 %618  ;;  %v736_v51 = vld [vmem:[#allocation2 + $0x20] sm:$0xff] }
  0xc2   : > { %635 = vst.msk [vmem:[#allocation2 + $0xb0] sm:$0xff] %vm402_vm2, %v619_v49  ;;  %964 = vmatprep.mubr.bf16.mxu0 %v736_v51 }
  0xc3   : > { %965 = vmatmul.mubr.bf16.gmra.mrb[4].mxu0 %v735_v48 }
  0xc4   : > { %v683_v52 = vpop.permute.xlu1 %682 }
  0xc5   : > { %699 = vst.msk [vmem:[#allocation2 + $0xb0] sm:$0xff] %vm467_vm3, %v683_v52  ;;  %v545_v0 = vpop.permute.xlu0 %544 }
  0xc6   : > { %566 = vst.msk [vmem:[#allocation2 + $0x38] sm:$0xff] %vm337_vm1, %v545_v0 }
  0xc8   : > { %v458_v53 = vpop.permute.xlu1 %457 }
  0xc9   : > { %475 = vst.msk [vmem:[#allocation2 + $0xa8] sm:$0xff] %vm467_vm3, %v458_v53  ;;  %v318_v54 = vpop.permute.xlu0 %317 }
  0xca   : > { %340 = vst.msk [vmem:[#allocation2 + $0x30] sm:$0xff] %vm337_vm1, %v318_v54 }
  0xcc   : > { %v383_v55 = vpop.permute.xlu1 %382  ;;  %v754_v57 = vld [vmem:[#allocation2 + $0xb0] sm:$0xff] }
  0xcd   : > { %v609_v58 = vpop.permute.xlu0 %608  ;;  %405 = vst.msk [vmem:[#allocation2 + $0x30] sm:$0xff] %vm402_vm2, %v383_v55  ;;  %1012 = vmatprep.mubr.bf16.mxu1 %v754_v57 }
  0xce   : > { %630 = vst.msk [vmem:[#allocation2 + $0x38] sm:$0xff] %vm402_vm2, %v609_v58 }
  0xd0   : > { %v448_v60 = vpop.permute.xlu1 %447  ;;  %v753_v61 = vld [vmem:[#allocation2 + $0xa8] sm:$0xff] }
  0xd1   : > { %v673_v62 = vpop.permute.xlu0 %672  ;;  %470 = vst.msk [vmem:[#allocation2 + $0x30] sm:$0xff] %vm467_vm3, %v448_v60  ;;  %1013 = vmatmul.mubr.bf16.gmra.mrb[4].mxu1 %v753_v61 }
  0xd2   : > { %694 = vst.msk [vmem:[#allocation2 + $0x38] sm:$0xff] %vm467_vm3, %v673_v62  ;;  %1502 = vmatprep.mubr.msk.bf16.mxu1 %vm272_vm0, %v734_v59 }
  0xd4   : > { %v320_v50 = vpop.permute.xlu1 %319 }
  0xd5   : > { %v547_v63 = vpop.permute.xlu0 %546  ;;  %341 = vst.msk [vmem:[#allocation2 + $0x48] sm:$0xff] %vm337_vm1, %v320_v50 }
  0xd6   : > { %567 = vst.msk [vmem:[#allocation2 + $0x50] sm:$0xff] %vm337_vm1, %v547_v63 }
  0xd8   : > { %v385_v3 = vpop.permute.xlu1 %384  ;;  %v738_v4 = vld [vmem:[#allocation2 + $0x30] sm:$0xff] }
  0xd9   : > { %v611_v5 = vpop.permute.xlu0 %610  ;;  %406 = vst.msk [vmem:[#allocation2 + $0x48] sm:$0xff] %vm402_vm2, %v385_v3  ;;  %v739_v6 = vld [vmem:[#allocation2 + $0x38] sm:$0xff]  ;;  %1503 = vmatmul.mubr.msk.bf16.vlgmr.msra.gmra.mrb[8].mxu1 %vm272_vm0, %v737_v1 }
  0xda   : > { %631 = vst.msk [vmem:[#allocation2 + $0x50] sm:$0xff] %vm402_vm2, %v611_v5  ;;  %972 = vmatprep.mubr.bf16.mxu0 %v739_v6  ;;  %1506 = vmatprep.mubr.msk.bf16.mxu1 %vm272_vm0, %v740_v2 }
  0xdb   : > { %973 = vmatmul.mubr.bf16.gmra.mrb[8].mxu0 %v738_v4 }
  0xdc   : > { %v450_v7 = vpop.permute.xlu1 %449 }
  0xdd   : > { %v675_v8 = vpop.permute.xlu0 %674  ;;  %471 = vst.msk [vmem:[#allocation2 + $0x48] sm:$0xff] %vm467_vm3, %v450_v7 }
  0xde   : > { %695 = vst.msk [vmem:[#allocation2 + $0x50] sm:$0xff] %vm467_vm3, %v675_v8 }
  0xe0   : > { %v322_v10 = vpop.permute.xlu1 %321 }
  0xe1   : > { %v549_v11 = vpop.permute.xlu0 %548  ;;  %342 = vst.msk [vmem:[#allocation2 + $0x60] sm:$0xff] %vm337_vm1, %v322_v10  ;;  %1507 = vmatmul.mubr.msk.bf16.gmra.mrb[12].mxu1 %vm272_vm0, %v743_v9 }
  0xe2   : > { %568 = vst.msk [vmem:[#allocation2 + $0x68] sm:$0xff] %vm337_vm1, %v549_v11  ;;  %1510 = vmatprep.mubr.msk.bf16.mxu1 %vm272_vm0, %v746_v24 }
  0xe4   : > { %v387_v12 = vpop.permute.xlu1 %386  ;;  %v741_v29 = vld [vmem:[#allocation2 + $0x48] sm:$0xff] }
  0xe5   : > { %v613_v13 = vpop.permute.xlu0 %612  ;;  %407 = vst.msk [vmem:[#allocation2 + $0x60] sm:$0xff] %vm402_vm2, %v387_v12  ;;  %v742_v14 = vld [vmem:[#allocation2 + $0x50] sm:$0xff] }
  0xe6   : > { %632 = vst.msk [vmem:[#allocation2 + $0x68] sm:$0xff] %vm402_vm2, %v613_v13  ;;  %980 = vmatprep.mubr.bf16.mxu0 %v742_v14 }
  0xe7   : > { %981 = vmatmul.mubr.bf16.gmra.mrb[12].mxu0 %v741_v29 }
  0xe8   : > { %v452_v16 = vpop.permute.xlu1 %451 }
  0xe9   : > { %v677_v17 = vpop.permute.xlu0 %676  ;;  %472 = vst.msk [vmem:[#allocation2 + $0x60] sm:$0xff] %vm467_vm3, %v452_v16  ;;  %1511 = vmatmul.mubr.msk.bf16.gmra.mrb[16].mxu1 %vm272_vm0, %v749_v15 }
  0xea   : > { %696 = vst.msk [vmem:[#allocation2 + $0x68] sm:$0xff] %vm467_vm3, %v677_v17  ;;  %1514 = vmatprep.mubr.msk.bf16.mxu1 %vm272_vm0, %v752_v56 }
  0xec   : > { %v324_v18 = vpop.permute.xlu1 %323 }
  0xed   : > { %v551_v19 = vpop.permute.xlu0 %550  ;;  %343 = vst.msk [vmem:[#allocation2 + $0x78] sm:$0xff] %vm337_vm1, %v324_v18 }
  0xee   : > { %569 = vst.msk [vmem:[#allocation2 + $0x80] sm:$0xff] %vm337_vm1, %v551_v19 }
  0xf0   : > { %v389_v21 = vpop.permute.xlu1 %388  ;;  %v744_v22 = vld [vmem:[#allocation2 + $0x60] sm:$0xff] }
  0xf1   : > { %v615_v23 = vpop.permute.xlu0 %614  ;;  %408 = vst.msk [vmem:[#allocation2 + $0x78] sm:$0xff] %vm402_vm2, %v389_v21  ;;  %v745_v25 = vld [vmem:[#allocation2 + $0x68] sm:$0xff]  ;;  %1515 = vmatmul.mubr.msk.bf16.gmra.mrb[20].mxu1 %vm272_vm0, %v755_v20 }
  0xf2   : > { %633 = vst.msk [vmem:[#allocation2 + $0x80] sm:$0xff] %vm402_vm2, %v615_v23  ;;  %988 = vmatprep.mubr.bf16.mxu0 %v745_v25 }
  0xf3   : > { %989 = vmatmul.mubr.bf16.gmra.mrb[16].mxu0 %v744_v22 }
  0xf4   : > { %v454_v26 = vpop.permute.xlu1 %453 }
  0xf5   : > { %v679_v27 = vpop.permute.xlu0 %678  ;;  %473 = vst.msk [vmem:[#allocation2 + $0x78] sm:$0xff] %vm467_vm3, %v454_v26 }
  0xf6   : > { %697 = vst.msk [vmem:[#allocation2 + $0x80] sm:$0xff] %vm467_vm3, %v679_v27 }
  0xfc   : > { %v747_v28 = vld [vmem:[#allocation2 + $0x78] sm:$0xff] }
  0xfd   : > { %v748_v30 = vld [vmem:[#allocation2 + $0x80] sm:$0xff] }
  0xfe   : > { %996 = vmatprep.mubr.bf16.mxu0 %v748_v30 }
  0xff   : > { %997 = vmatmul.mubr.bf16.gmra.mrb[20].mxu0 %v747_v28 }
 0x105   : > { %v1142_v55 = vpop.permute.xlu1 %1141 }
 0x106   : > { %v1137_v58 = vpop.permute.xlu0 %1136 }
 0x109   : > { %v1147_v6 = vpop.permute.xlu1 %1146 }
 0x10a   : > { %v1152_v10 = vpop.permute.xlu0 %1151 }
 0x10d   : > { %v1157_v17 = vpop.permute.xlu1 %1156 }
 0x10e   : > { %v1162_v22 = vpop.permute.xlu0 %1161 }
 0x17e   : > { %v1440_v31 = vpop.f32.mrb[0].mxu0 }
 0x17f   : > { %v1441_v32 = vpop.f32.mrb[1].mxu0 }
 0x180   : > { %v1442_v33 = vadd.f32 %v1441_v32, %v1440_v31  ;;  %v1443_v34 = vpop.f32.mrb[2].mxu0 }
 0x181   : > { %v1444_v35 = vpop.f32.mrb[3].mxu0 }
 0x182   : > { %v1445_v36 = vadd.f32 %v1444_v35, %v1443_v34 }
 0x18c   : > { %v1476_v37 = vpop.f32.mrb[0].mxu1 }
 0x18d   : > { %v1477_v38 = vpop.f32.mrb[1].mxu1 }
 0x18e   : > { %v2198_v39 = vadd.f32 %v1477_v38, %v1476_v37  ;;  %v1479_v40 = vpop.f32.mrb[2].mxu1  ;;  %v1167_v38 = vpop.permute.xlu1 %1166 }
 0x18f   : > { %v1480_v41 = vpop.f32.mrb[3].mxu1 }
 0x190   : > { %v2200_v42 = vadd.f32 %v1480_v41, %v1479_v40 }
 0x196   : > { %v1446_v43 = vpop.f32.mrb[4].mxu0 }
 0x197   : > { %v1447_v44 = vpop.f32.mrb[5].mxu0 }
 0x198   : > { %v1448_v45 = vadd.f32 %v1447_v44, %v1446_v43  ;;  %v1449_v46 = vpop.f32.mrb[6].mxu0  ;;  %v1172_v44 = vpop.permute.xlu0 %1171 }
 0x199   : > { %v1450_v47 = vpop.f32.mrb[7].mxu0 }
 0x19a   : > { %v1451_v48 = vadd.f32 %v1450_v47, %v1449_v46 }
 0x1a4   : > { %v1482_v49 = vpop.f32.mrb[4].mxu1 }
 0x1a5   : > { %v1483_v51 = vpop.f32.mrb[5].mxu1 }
 0x1a6   : > { %v1484_v52 = vadd.f32 %v1483_v51, %v1482_v49  ;;  %v1485_v0 = vpop.f32.mrb[6].mxu1 }
 0x1a7   : > { %v1486_v53 = vpop.f32.mrb[7].mxu1 }
 0x1a8   : > { %v2202_v54 = vadd.f32 %v1486_v53, %v1485_v0 }
 0x1ac   : > { %v1504_v57 = vpop.f32.mrb[8].mxu1 }
 0x1ad   : > { %v1064_v59 = vadd.f32 %v1504_v57, %v1448_v45  ;;  %v1055_v60 = vpop.f32.mrb[9].mxu1 }
 0x1ae   : > { %v1452_v61 = vpop.f32.mrb[8].mxu0  ;;  %v1056_v62 = vadd.f32 %v1442_v33, %v1055_v60  ;;  %v1505_v50 = vpop.f32.mrb[10].mxu1 }
 0x1af   : > { %v1453_v63 = vpop.f32.mrb[9].mxu0  ;;  %v1067_v1 = vadd.f32 %v1505_v50, %v1451_v48  ;;  %v1058_v2 = vpop.f32.mrb[11].mxu1  ;;  %v1216_v11 = vmul.f32 %v1147_v6, %v1064_v59 }
 0x1b0   : > { %v1454_v3 = vadd.f32 %v1453_v63, %v1452_v61  ;;  %v1455_v4 = vpop.f32.mrb[10].mxu0  ;;  %v1059_v5 = vadd.f32 %v1445_v36, %v1058_v2  ;;  %v1214_v8 = vmul.f32 %v1137_v58, %v1056_v62  ;;  %v1177_v2 = vpop.permute.xlu1 %1176 }
 0x1b1   : > { %v1456_v7 = vpop.f32.mrb[11].mxu0  ;;  %v1217_v14 = vmul.f32 %v1152_v10, %v1067_v1 }
 0x1b2   : > { %v1215_v9 = vmul.f32 %v1142_v55, %v1059_v5  ;;  %v1457_v24 = vadd.f32 %v1456_v7, %v1455_v4 }
 0x1b4   : > { %v1230_v12 = vadd.f32 %v1215_v9, %v1214_v8  ;;  %v1508_v29 = vpop.f32.mrb[12].mxu1  ;;  %v1187_v8 = vpop.permute.xlu1 %1186 }
 0x1b5   : > { %v1071_v13 = vpop.f32.mrb[13].mxu1 }
 0x1b6   : > { %v1231_v15 = vadd.f32 %v1230_v12, %v1216_v11  ;;  %v1072_v56 = vadd.f32 %v1454_v3, %v1071_v13  ;;  %v1509_v16 = vpop.f32.mrb[14].mxu1 }
 0x1b7   : > { %v1074_v18 = vpop.f32.mrb[15].mxu1 }
 0x1b8   : > { %v1218_v19 = vmul.f32 %v1157_v17, %v1072_v56  ;;  %v1232_v20 = vadd.f32 %v1231_v15, %v1217_v14  ;;  %v1075_v21 = vadd.f32 %v1457_v24, %v1074_v18  ;;  %v1197_v14 = vpop.permute.xlu1 %1196 }
 0x1ba   : > { %v1233_v23 = vadd.f32 %v1232_v20, %v1218_v19  ;;  %v1219_v25 = vmul.f32 %v1162_v22, %v1075_v21  ;;  %v1458_v26 = vpop.f32.mrb[12].mxu0 }
 0x1bb   : > { %v1459_v27 = vpop.f32.mrb[13].mxu0 }
 0x1bc   : > { %v1234_v28 = vadd.f32 %v1233_v23, %v1219_v25  ;;  %v1460_v30 = vadd.f32 %v1459_v27, %v1458_v26  ;;  %v1461_v31 = vpop.f32.mrb[14].mxu0  ;;  %v1512_v32 = vpop.f32.mrb[16].mxu1 }
 0x1bd   : > { %v1462_v33 = vpop.f32.mrb[15].mxu0  ;;  %v1087_v34 = vpop.f32.mrb[17].mxu1 }
 0x1be   : > { %v1080_v35 = vadd.f32 %v1508_v29, %v1460_v30  ;;  %v1463_v36 = vadd.f32 %v1462_v33, %v1461_v31  ;;  %v1513_v37 = vpop.f32.mrb[18].mxu1  ;;  %v1207_v21 = vpop.permute.xlu1 %1206 }
 0x1bf   : > { %v1090_v40 = vpop.f32.mrb[19].mxu1 }
 0x1c0   : > { %v1220_v41 = vmul.f32 %v1167_v38, %v1080_v35  ;;  %v1083_v43 = vadd.f32 %v1509_v16, %v1463_v36  ;;  %v1251_v35 = vld [vmem:[%s1849_s21] sm:$0xff] }
 0x1c2   : > { %v1235_v45 = vadd.f32 %v1234_v28, %v1220_v41  ;;  %v1221_v46 = vmul.f32 %v1172_v44, %v1083_v43 }
 0x1c4   : > { %v1236_v47 = vadd.f32 %v1235_v45, %v1221_v46  ;;  %v1516_v48 = vpop.f32.mrb[20].mxu1 }
 0x1c5   : > { %v1112_v49 = vadd.f32 %v1516_v48, %v1484_v52  ;;  %v1103_v51 = vpop.f32.mrb[21].mxu1  ;;  %v1182_v52 = vpop.permute.xlu0 %1181 }
 0x1c6   : > { %v1464_v0 = vpop.f32.mrb[16].mxu0  ;;  %v1104_v53 = vadd.f32 %v2198_v39, %v1103_v51  ;;  %v1517_v55 = vpop.f32.mrb[22].mxu1 }
 0x1c7   : > { %v1465_v57 = vpop.f32.mrb[17].mxu0  ;;  %v1115_v58 = vadd.f32 %v1517_v55, %v2202_v54  ;;  %v1106_v59 = vpop.f32.mrb[23].mxu1  ;;  %v1228_v22 = vmul.f32 %v1207_v21, %v1112_v49 }
 0x1c8   : > { %v1466_v60 = vadd.f32 %v1465_v57, %v1464_v0  ;;  %v1467_v61 = vpop.f32.mrb[18].mxu0  ;;  %v1107_v62 = vadd.f32 %v2200_v42, %v1106_v59  ;;  %v1226_v17 = vmul.f32 %v1197_v14, %v1104_v53 }
 0x1c9   : > { %v1468_v50 = vpop.f32.mrb[19].mxu0  ;;  %v1192_v10 = vpop.permute.xlu0 %1191 }
 0x1ca   : > { %v1088_v63 = vadd.f32 %v1466_v60, %v1087_v34  ;;  %v1469_v1 = vadd.f32 %v1468_v50, %v1467_v61 }
 0x1cc   : > { %v1222_v3 = vmul.f32 %v1177_v2, %v1088_v63  ;;  %v1091_v4 = vadd.f32 %v1469_v1, %v1090_v40  ;;  %v1417_v40 = vld [vmem:[%s2272_s3] ss:$0 sm:$0xff] (!%p1416_p1) }
 0x1cd   : > { %v1202_v16 = vpop.permute.xlu0 %1201 }
 0x1ce   : > { %v1237_v5 = vadd.f32 %v1236_v47, %v1222_v3  ;;  %v1223_v6 = vmul.f32 %v1182_v52, %v1091_v4  ;;  %v1227_v19 = vmul.f32 %v1202_v16, %v1107_v62 }
 0x1d0   : > { %v1238_v7 = vadd.f32 %v1237_v5, %v1223_v6 }
 0x1d1   : > { %v1212_v25 = vpop.permute.xlu0 %1211 }
 0x1d2   : > { %v1470_v39 = vpop.f32.mrb[20].mxu0  ;;  %v1229_v26 = vmul.f32 %v1212_v25, %v1115_v58 }
 0x1d3   : > { %v1471_v9 = vpop.f32.mrb[21].mxu0 }
 0x1d4   : > { %v1472_v24 = vadd.f32 %v1471_v9, %v1470_v39  ;;  %v1473_v54 = vpop.f32.mrb[22].mxu0 }
 0x1d5   : > { %v1474_v11 = vpop.f32.mrb[23].mxu0 }
 0x1d6   : > { %v1096_v12 = vadd.f32 %v1512_v32, %v1472_v24  ;;  %v1475_v29 = vadd.f32 %v1474_v11, %v1473_v54 }
 0x1d8   : > { %v1224_v42 = vmul.f32 %v1187_v8, %v1096_v12  ;;  %v1099_v13 = vadd.f32 %v1513_v37, %v1475_v29 }
 0x1da   : > { %v1239_v15 = vadd.f32 %v1238_v7, %v1224_v42  ;;  %v1225_v56 = vmul.f32 %v1192_v10, %v1099_v13 }
 0x1dc   : > { %v1240_v18 = vadd.f32 %v1239_v15, %v1225_v56 }
 0x1de   : > { %v1241_v20 = vadd.f32 %v1240_v18, %v1226_v17 }
 0x1e0   : > { %v1242_v23 = vadd.f32 %v1241_v20, %v1227_v19 }
 0x1e2   : > { %v1243_v27 = vadd.f32 %v1242_v23, %v1228_v22 }
 0x1e4   : > { %v1244_v28 = vadd.f32 %v1243_v27, %v1229_v26 }
 0x1e6   : > { %v1245_v30 = vrot.slane %v1244_v28, 4 }
 0x1e8   : > { %v1246_v31 = vadd.f32 %v1245_v30, %v1244_v28 }
 0x1ea   : > { %v1247_v32 = vrot.slane %v1246_v31, 2 }
 0x1ec   : > { %v1248_v33 = vadd.f32 %v1247_v32, %v1246_v31 }
 0x1ee   : > { %v1249_v34 = vrot.slane %v1248_v33, 1  ;;  %1257 = sbr.rel (%p1416_p1) target bundleno = 539 (0x21b), region = 44 }
 0x1f0   : > { %v1250_v36 = vadd.f32 %v1249_v34, %v1248_v33 }
 0x1f2   : > { %v1252_v37 = vadd.f32 %v1251_v35, %v1250_v36 }
 0x1f4   : > { %1253 = vst [vmem:[%s1849_s21] sm:$0xff] %v1252_v37 }
 0x1fb   : > { %v1258_v38 = vld [vmem:[%s1849_s21] sm:$0xff] }
 0x1fc   : > { %v1259_v41 = vmul.f32 0.00390625, %v1258_v38 }
 0x1fe   : > { %v1267_v43 = vadd.f32 %v1417_v40, %v1259_v41 }
 0x200   : > { %v1418_v44 = vmul.f32 -1.442695, %v1267_v43 }
 0x202   : > { %1632 = vpow2.f32 %v1418_v44 }
 0x20c   : > { %v1633_v45 = vpop.eup %1632 }
 0x20d   : > { %v1271_v46 = vadd.f32 1.0, %v1633_v45 }
 0x20f   : > { %1634 = vrcp.f32 %v1271_v46 }
 0x219   : > { %v1635_v47 = vpop.eup %1634 }
 0x21a   : > { %1274 = vst [vmem:[%s1849_s21] sm:$0xff] %v1635_v47 }
 0x21b PF: > { %s1420_s18 = sshll.u32 %s1718_s19, 7  ;;  %s1289_s9 = sshll.u32 %s1849_s21, 4  ;;  %s1290_s9 = int_to_ptr.vmem [resolvable:$true] %s1289_s9 }
 0x21c   : > { %s2219_s30 = scalar_lea.hbm %s2273_s4, %s1420_s18  ;;  %s1276_s10 = scalar_lea.sflag [#allocation4], %s225_s6 }
 0x21d   : > { %s1636_s11 = scalar_lea.vmem %s1290_s9, 128  ;;  %s1737_s12 = smov [#allocation3]  }
 0x21e   : > { %p1637_p2 = scmp.ne.s32.totalorder %s1290_s9, %s1636_s11  ;;  %s1640_s13 = sshll.u32 %s1737_s12, 4  ;;  %s1641_s13 = int_to_ptr.vmem [resolvable:$false] %s1640_s13 }
 0x21f   : > { %s1642_s14 = scalar_lea.vmem %s1641_s13, 256  ;;  %p1643_p6 = scmp.lt.s32.totalorder %s1290_s9, %s1641_s13 }
 0x220   : > { %p1638_p4 = pnand %p1637_p2, %p1812_p3  ;;  %p1644_p7 = scmp.lt.s32.totalorder %s1642_s14, %s1636_s11 }
 0x222   : > { %p1639_p5 = pneg %p1638_p4  ;;  %p1645_p8 = por %p1644_p7, %p1643_p6 }
 0x224   : > { %p1646_p10 = pnand %p1645_p8, %p1639_p5 }
 0x226   : > { %1649 = shalt.err (!%p1646_p10)
}
 0x227   : > { %s1650_s19 = scalar_lea.hbm %s2219_s30, 128  ;;  %s1654_s24 = scalar_lea.hbm %s2273_s4, 256 }
 0x228   : > { %p1651_p11 = scmp.ne.s32.totalorder %s2219_s30, %s1650_s19  ;;  %p1655_p0 = scmp.lt.u32.totalorder %s2219_s30, %s2273_s4 }
 0x229   : > { %p1656_p1 = scmp.lt.u32.totalorder %s1654_s24, %s1650_s19  ;;  %p1658_p4 = scmp.lt.u32.totalorder %s1650_s19, %s2219_s30 }
 0x22a   : > { %p1652_p12 = pnand %p1651_p11, %p1812_p3 }
 0x22b   : > { %p1657_p2 = por %p1656_p1, %p1655_p0 }
 0x22c   : > { %p1653_p13 = pneg %p1652_p12 }
 0x22d   : > { %p1659_p5 = por %p1658_p4, %p1657_p2 }
 0x22f   : > { %p1660_p6 = pnand %p1659_p5, %p1653_p13 }
 0x231   : > { %1663 = shalt.err (!%p1660_p6)
}
 0x232   : > { %1536 = dma.vmem_to_hbm [thread:$0]  (%p1812_p3), %s1290_s9, 128, %s2219_s30, %s1276_s10  }
 0x233 PF: > { %p1542_p7 = scmp.ge.s32.totalorder %s1730_s22, 2  ;;  %s1301_s26 = sand.u32 1, %s1702_s15  }
 0x234   : > { %s1302_s7 = scalar_lea.sflag [#allocation4], %s1301_s26 }
 0x235   : > { %p1539_p8 = pnand %p1542_p7, %p1822_p9 }
 0x237   : > { %1697 = dma.done.wait (!%p1539_p8), %s1302_s7, 128  }
 0x238   : > { %1699 = vsyncadd (!%p1539_p8), %s1302_s7, 4294967168  ;;  %s17_s22 = sadd.s32 1, %s1730_s22   ;;  %s2281_s19 = sld [smem:[#allocation6_spill]] }
 0x239   : > { %p14_p10 = scmp.ge.s32.totalorder %s17_s22, 8   ;;  %s2282_s27 = sld [smem:[#allocation7_spill]] }
 0x23a   : > { %s2283_s21 = sld [smem:[#allocation8_spill]]  ;;  %s2284_s15 = smov %s1706_s16 }
 0x23b   : > { %s2285_s16 = smov %s1710_s17  ;;  %s2286_s17 = smov %s1830_s5 }
 0x23c   : > { %s2287_s18 = smov %s1722_s20  ;;  %16 = sbr.rel (!%p14_p10) target bundleno = 5 (0x5), region = 82 }
 0x23f   : > { %s2288_s20 = smov %s2282_s27 }
 0x243   :  { %1307 = vsyncpa [#allocation4], 1 }
 0x244   :  { %1309 = vsyncpa [#allocation4 + $0x1], 1 }

</bundles_post_ra>
